<compile_context>
chip_gen: v7x
topology: tpu7x:2x2x1
jax: 0.10.0
libtpu: 0.0.40
codegen_flags: <defaults>
</compile_context>

<pallas_src>
import functools

import numpy as np
import jax
import jax.numpy as jnp
from jax.experimental import pallas as pl
from jax.experimental.pallas import tpu as pltpu


# ---------------------------------------------------------------------------
# Fused kernel: SplitPoisson-style prep + iter_stop LPGD gradient steps.
# ---------------------------------------------------------------------------
def _lpgd_kernel(d_ref, h1_ref, ht_ref, h_ref, out_ref, *, steps, prep_scale):
    """One batch tile of prep + LPGD iterations (x0 = 0, denoi = Identity).

    d_ref  : (tb, M) f32   de-interleaved split measurements (y+ - y-)
    h1_ref : (1, M)  f32   H @ 1 (batch-invariant prep offset, precomputed)
    ht_ref : (N, M)  bf16  H^T  -> forward_H(x) = x @ H^T
    h_ref  : (M, N)  bf16  H    -> adjoint(r)   = r @ H
    """
    # prep: m = 2*(y+ - y-)/alpha - H @ 1  (kept f32 on the VPU)
    m = prep_scale * d_ref[...] - h1_ref[...]                          # (tb, M)

    # LPGD with x0 = 0: first iteration collapses to a single adjoint matmul.
    # Dot inputs cast to bf16 (native MXU path), accumulation in f32.
    x = steps[0] * jnp.dot(m.astype(jnp.bfloat16), h_ref[...],
                           preferred_element_type=jnp.float32)
    for s in steps[1:]:
        res = jnp.dot(x.astype(jnp.bfloat16), ht_ref[...],
                      preferred_element_type=jnp.float32) - m
        x = x - s * jnp.dot(res.astype(jnp.bfloat16), h_ref[...],
                            preferred_element_type=jnp.float32)

    # TODO(synk): a learned denoiser (denoi != Identity) between iterations is
    # not fused here; it would be a separate kernel / XLA call per iteration.
    out_ref[...] = x.astype(out_ref.dtype)


# ---------------------------------------------------------------------------
# Streaming fallback: K-tiled matmul kernel (operators stay in HBM).
# ---------------------------------------------------------------------------
def _matmul_kernel(a_ref, b_ref, o_ref, acc_ref):
    @pl.when(pl.program_id(2) == 0)
    def _():
        acc_ref[...] = jnp.zeros_like(acc_ref)
    acc_ref[...] += jnp.dot(a_ref[...].astype(jnp.bfloat16), b_ref[...],
                            preferred_element_type=jnp.float32)

    @pl.when(pl.program_id(2) == pl.num_programs(2) - 1)
    def _():
        o_ref[...] = acc_ref[...].astype(o_ref.dtype)


def _pick_tile(dim, unit, cap):
    """Largest multiple of `unit` that divides `dim`, capped at `cap`."""
    if dim <= unit:
        return dim
    t = min((dim // unit) * unit, (cap // unit) * unit)
    while t > unit and dim % t:
        t -= unit
    return t if (t > 0 and dim % t == 0) else dim


def _streaming_matmul(a, b_bf16, *, cap_rows=256, cap_cols=512, cap_k=512):
    """(R, K) f32 @ (K, C) bf16 -> (R, C) f32 with a standard K-tiled grid."""
    R, K = a.shape
    _, C = b_bf16.shape
    tr = _pick_tile(R, 8, cap_rows)
    tc = _pick_tile(C, 128, cap_cols)
    tk = _pick_tile(K, 128, cap_k)
    grid = (R // tr, C // tc, K // tk)
    return pl.pallas_call(
        _matmul_kernel,
        out_shape=jax.ShapeDtypeStruct((R, C), jnp.float32),
        grid_spec=pltpu.PrefetchScalarGridSpec(
            num_scalar_prefetch=0,
            grid=grid,
            in_specs=[pl.BlockSpec((tr, tk), lambda i, j, k: (i, k)),
                      pl.BlockSpec((tk, tc), lambda i, j, k: (k, j))],
            out_specs=pl.BlockSpec((tr, tc), lambda i, j, k: (i, j)),
            scratch_shapes=[pltpu.VMEM((tr, tc), jnp.float32)]),
        compiler_params=pltpu.CompilerParams(
            dimension_semantics=("parallel", "parallel", "arbitrary")),
    )(a, b_bf16)


def _reconstruct_streaming(d, h1, HT, Hm, steps, prep_scale):
    """LPGD with operators left in HBM, streamed K-tile by K-tile.

    The prep and x-updates are cheap elementwise XLA ops between matmul calls.
    """
    m = prep_scale * d - h1                                # (bc, M)
    x = steps[0] * _streaming_matmul(m, Hm)                # x0 = 0 shortcut
    for s in steps[1:]:
        res = _streaming_matmul(x, HT) - m
        x = x - s * _streaming_matmul(res, Hm)
    return x


# ---------------------------------------------------------------------------
# Host-side helpers
# ---------------------------------------------------------------------------
def _step_schedule(N, iter_stop, step, step_decay):
    # LearnedPGD.set_stepsize: step = 1/meas_op.N (Lipschitz const of Hadamard),
    # PositiveParameters -> positive steps, step_schedule applies the decay.
    if step is None:
        step = 1.0 / N
    return tuple(abs(step) * (step_decay ** i) for i in range(iter_stop))


def _round_up(x, m):
    return ((x + m - 1) // m) * m


def _pick_batch_tile(bc_pad, tb_max=256):
    """Batch tile: multiple of 8, <= tb_max, and >= 2 grid steps if possible
    so both v7x TensorCores get work on the 'parallel' batch axis."""
    if bc_pad <= 8:
        return bc_pad
    candidates = [t for t in (256, 128, 64, 32, 16, 8)
                  if t <= tb_max and bc_pad % t == 0]
    for t in candidates:
        if bc_pad // t >= 2:
            return t
    return candidates[0] if candidates else bc_pad


def _vmem_capacity_bytes():
    try:
        return int(pltpu.get_tpu_info().vmem_capacity_bytes)
    except Exception:
        return 64 << 20   # conservative default (v7x per-TensorCore)


def _resident_vmem_bytes(tb, M, N):
    """VMEM needed by the fused resident-operator kernel (incl. intermediates)."""
    return int(
        2 * tb * M * 4          # d tile, double-buffered f32
        + M * 4                 # H@1, single-buffered f32
        + N * M * 2             # H^T, single-buffered bf16
        + M * N * 2             # H,   single-buffered bf16
        + 2 * tb * N * 4        # output tile, double-buffered f32
        + 4 * tb * (N + 2 * M)  # in-kernel f32 intermediates (x, m, res)
        + 2 * tb * (N + M)      # bf16 casts at the matmul inputs
        + (2 << 20))            # compiler internal scratch headroom


def _reconstruct_resident(d, h1, HT, Hm, steps, prep_scale, tb,
                          vmem_needed, budget):
    bc, M = d.shape
    N = Hm.shape[1]
    grid = (bc // tb,)
    kernel = functools.partial(_lpgd_kernel, steps=steps, prep_scale=prep_scale)

    # First iteration = 1 matmul, remaining = 2 matmuls each.
    flops = 2 * bc * M * N * (2 * len(steps) - 1)
    bytes_accessed = 4 * bc * M + 4 * M + 2 * (2 * M * N) + 4 * bc * N
    vmem_limit = int(min(budget, max(vmem_needed + (4 << 20), 32 << 20)))

    def build(single_buffer):
        inv = dict(pipeline_mode=pl.Buffered(1)) if single_buffer else {}
        return pl.pallas_call(
            kernel,
            out_shape=jax.ShapeDtypeStruct((bc, N), jnp.float32),
            grid_spec=pltpu.PrefetchScalarGridSpec(
                num_scalar_prefetch=0,
                grid=grid,
                in_specs=[
                    pl.BlockSpec((tb, M), lambda i: (i, 0)),        # y+ - y-
                    pl.BlockSpec((1, M), lambda i: (0, 0), **inv),  # H @ 1
                    pl.BlockSpec((N, M), lambda i: (0, 0), **inv),  # H^T
                    pl.BlockSpec((M, N), lambda i: (0, 0), **inv),  # H
                ],
                out_specs=pl.BlockSpec((tb, N), lambda i: (i, 0)),
            ),
            compiler_params=pltpu.CompilerParams(
                dimension_semantics=("parallel",),
                vmem_limit_bytes=vmem_limit),
            cost_estimate=pl.CostEstimate(flops=flops, transcendentals=0,
                                          bytes_accessed=bytes_accessed),
        )

    try:
        return build(True)(d, h1, HT, Hm)
    except Exception:
        # Fallback if Buffered(1) single-buffering is rejected by this runtime.
        return build(False)(d, h1, HT, Hm)


def learned_pgd_reconstruct(y_split, H, *, iter_stop=3, step=None,
                            step_decay=1.0, alpha=1.0, tb=None,
                            force_streaming=False):
    """LearnedPGD.reconstruct() (defaults: x0=0, wls=False, denoi=Identity)."""
    bc, two_m = y_split.shape
    M = two_m // 2
    N = H.shape[1]

    # prep, part 1 (host, trivially cheap): de-interleave the +/- split.
    # TODO(synk): this strided de-interleave is not fused into the kernel;
    # it only matters on the DMA-bound small-batch path.
    d = (y_split[:, 0::2] - y_split[:, 1::2]).astype(jnp.float32)      # (bc, M)

    # Batch-invariant prep offset H @ 1, computed once on the host (f32).
    h1 = (H.astype(jnp.float32) @ jnp.ones((N,), jnp.float32)).reshape(1, M)

    # Operators in bf16: exact for the +/-1 entries of Hadamard-split H.
    # TODO(synk): for a general (non +/-1 valued) H, bf16 storage is lossy.
    HT = jnp.asarray(H.T, jnp.bfloat16)     # (N, M): forward_H(x) = x @ HT
    Hm = jnp.asarray(H, jnp.bfloat16)       # (M, N): adjoint(r)   = r @ Hm

    steps = _step_schedule(N, iter_stop, step, step_decay)
    prep_scale = 2.0 / alpha

    # Pad batch to a multiple of 8 (clean sublane tiles, no masked stores).
    bc_pad = max(_round_up(bc, 8), 8)
    if bc_pad != bc:
        d = jnp.pad(d, ((0, bc_pad - bc), (0, 0)))

    if tb is None:
        tb = _pick_batch_tile(bc_pad)
    assert bc_pad % tb == 0, "batch tile must divide (padded) batch*channels"

    vmem_needed = _resident_vmem_bytes(tb, M, N)
    budget = _vmem_capacity_bytes() - (8 << 20)     # leave compiler headroom

    if force_streaming or vmem_needed > budget:
        out = _reconstruct_streaming(d, h1, HT, Hm, steps, prep_scale)
    else:
        out = _reconstruct_resident(d, h1, HT, Hm, steps, prep_scale, tb,
                                    vmem_needed, budget)
    return out[:bc]


def simulate_split_acquisition(x_flat, H):
    """NoNoise + HadamSplit-style acquisition: interleaved +/- measurements
    of the normalized image (x+1)/2. Shape (BC, N) -> (BC, 2M)."""
    Hpos = jnp.maximum(H, 0.0)
    Hneg = jnp.maximum(-H, 0.0)
    u = (x_flat + 1.0) / 2.0
    ypos = u @ Hpos.T
    yneg = u @ Hneg.T
    return jnp.stack([ypos, yneg], axis=-1).reshape(x_flat.shape[0], -1)


def learned_pgd_forward(x, H, **kwargs):
    """Full LearnedPGD.forward: (B,C,h,w) -> (B,C,h,w)."""
    b, c, hh, ww = x.shape
    N = hh * ww
    x_flat = x.reshape(b * c, N)
    y = simulate_split_acquisition(x_flat, H)            # acqu(x)
    z = learned_pgd_reconstruct(y, H, **kwargs)          # reconstruct(y)
    return z.reshape(b, c, hh, ww)


# ---------------------------------------------------------------------------
# Pure-JAX reference (mirrors LearnedPGD.reconstruct with defaults, f32)
# ---------------------------------------------------------------------------
def reference_forward(x, H, *, iter_stop=3, step=None, step_decay=1.0,
                      alpha=1.0):
    b, c, hh, ww = x.shape
    N = hh * ww
    x_flat = x.reshape(b * c, N)
    y = simulate_split_acquisition(x_flat, H)
    d = y[:, 0::2] - y[:, 1::2]
    m = 2.0 * d / alpha - H @ jnp.ones((N,), jnp.float32)
    steps = _step_schedule(N, iter_stop, step, step_decay)
    hi = jax.lax.Precision.HIGHEST
    xk = jnp.zeros((b * c, N), jnp.float32)
    for s in steps:
        res = jnp.dot(xk, H.T, precision=hi) - m
        xk = xk - s * jnp.dot(res, H, precision=hi)
    return xk.reshape(b, c, hh, ww)


def _hadamard(n):
    """Sylvester Hadamard matrix of size n (power of 2), float32."""
    Hm = np.array([[1.0]], dtype=np.float32)
    while Hm.shape[0] < n:
        Hm = np.block([[Hm, Hm], [Hm, -Hm]]).astype(np.float32)
    return Hm


if __name__ == "__main__":
    B, C, hh, ww = 2, 4, 16, 16
    N = hh * ww                 # 256
    M = N                       # full Hadamard sampling (as in the docstring)

    key = jax.random.PRNGKey(0)
    x = jax.random.uniform(key, (B, C, hh, ww), dtype=jnp.float32,
                           minval=-1.0, maxval=1.0)

    # Measurement operator: Hadamard rows.
    # TODO(synk): HadamSplit's Ord (significance ordering) permutation is not modeled.
    Hfull = jnp.asarray(_hadamard(N))
    H = Hfull[:M, :]

    ref = jax.block_until_ready(reference_forward(x, H))

    # Fused resident-operator kernel path.
    z = jax.block_until_ready(learned_pgd_forward(x, H))
    assert z.shape == (B, C, hh, ww)
    # The kernel feeds bf16 inputs to the MXU (operators are exact +/-1,
    # activations are bf16-quantized), so compare against the f32-HIGHEST
    # reference at bf16-level tolerance.
    np.testing.assert_allclose(np.asarray(z), np.asarray(ref),
                               rtol=5e-2, atol=5e-2)

    # Streaming (HBM-resident operator) fallback path, exercised explicitly.
    z2 = jax.block_until_ready(learned_pgd_forward(x, H, force_streaming=True))
    np.testing.assert_allclose(np.asarray(z2), np.asarray(ref),
                               rtol=5e-2, atol=5e-2)

    print("KERNEL_OK")
</pallas_src>

<mosaic_0001>
module attributes {stable_mosaic.version = 11 : i64} {
  func.func @_lpgd_kernel(%arg0: i32, %arg1: memref<8x256xf32, #tpu.memory_space<vmem>>, %arg2: memref<1x256xf32, #tpu.memory_space<vmem>>, %arg3: memref<256x256xbf16, #tpu.memory_space<vmem>>, %arg4: memref<256x256xbf16, #tpu.memory_space<vmem>>, %arg5: memref<8x256xf32, #tpu.memory_space<vmem>>) attributes {dimension_semantics = [#tpu.dimension_semantics<parallel>], iteration_bounds = array<i64: 1>, scalar_prefetch = 0 : i64, scratch_operands = 0 : i64, tpu.core_type = #tpu.core_type<tc>, window_params = [{transform_indices = @transform_0, window_bounds = array<i64: 8, 256>}, {pipeline_mode = #tpu.pipeline_mode<synchronous>, transform_indices = @transform_1, window_bounds = array<i64: 1, 256>}, {pipeline_mode = #tpu.pipeline_mode<synchronous>, transform_indices = @transform_2, window_bounds = array<i64: 256, 256>}, {pipeline_mode = #tpu.pipeline_mode<synchronous>, transform_indices = @transform_3, window_bounds = array<i64: 256, 256>}, {transform_indices = @transform_4, window_bounds = array<i64: 8, 256>}]} {
    %c0 = arith.constant 0 : index
    %c0_0 = arith.constant 0 : index
    %0 = vector.load %arg1[%c0, %c0_0] : memref<8x256xf32, #tpu.memory_space<vmem>>, vector<8x256xf32>
    %cst = arith.constant 2.000000e+00 : f32
    %1 = vector.broadcast %cst : f32 to vector<8x256xf32>
    %2 = arith.mulf %1, %0 : vector<8x256xf32>
    %c0_1 = arith.constant 0 : index
    %c0_2 = arith.constant 0 : index
    %3 = vector.load %arg2[%c0_1, %c0_2] : memref<1x256xf32, #tpu.memory_space<vmem>>, vector<1x256xf32>
    %4 = vector.broadcast %3 : vector<1x256xf32> to vector<8x256xf32>
    %5 = arith.subf %2, %4 : vector<8x256xf32>
    %6 = arith.truncf %5 : vector<8x256xf32> to vector<8x256xbf16>
    %c0_3 = arith.constant 0 : index
    %c0_4 = arith.constant 0 : index
    %7 = vector.load %arg4[%c0_3, %c0_4] : memref<256x256xbf16, #tpu.memory_space<vmem>>, vector<256x256xbf16>
    %cst_5 = arith.constant dense<0.000000e+00> : vector<8x256xf32>
    %8 = tpu.matmul %6, %7, %cst_5 {dimension_numbers = #tpu.dot_dimension_numbers<[1], [0], [0], [1], [0, 0, 1, 1], [], []>} : vector<8x256xbf16>, vector<256x256xbf16>, vector<8x256xf32> -> vector<8x256xf32>
    %cst_6 = arith.constant 3.906250e-03 : f32
    %9 = vector.broadcast %cst_6 : f32 to vector<8x256xf32>
    %10 = arith.mulf %9, %8 : vector<8x256xf32>
    %11 = arith.truncf %10 : vector<8x256xf32> to vector<8x256xbf16>
    %c0_7 = arith.constant 0 : index
    %c0_8 = arith.constant 0 : index
    %12 = vector.load %arg3[%c0_7, %c0_8] : memref<256x256xbf16, #tpu.memory_space<vmem>>, vector<256x256xbf16>
    %cst_9 = arith.constant dense<0.000000e+00> : vector<8x256xf32>
    %13 = tpu.matmul %11, %12, %cst_9 {dimension_numbers = #tpu.dot_dimension_numbers<[1], [0], [0], [1], [0, 0, 1, 1], [], []>} : vector<8x256xbf16>, vector<256x256xbf16>, vector<8x256xf32> -> vector<8x256xf32>
    %14 = arith.subf %13, %5 : vector<8x256xf32>
    %15 = arith.truncf %14 : vector<8x256xf32> to vector<8x256xbf16>
    %c0_10 = arith.constant 0 : index
    %c0_11 = arith.constant 0 : index
    %16 = vector.load %arg4[%c0_10, %c0_11] : memref<256x256xbf16, #tpu.memory_space<vmem>>, vector<256x256xbf16>
    %cst_12 = arith.constant dense<0.000000e+00> : vector<8x256xf32>
    %17 = tpu.matmul %15, %16, %cst_12 {dimension_numbers = #tpu.dot_dimension_numbers<[1], [0], [0], [1], [0, 0, 1, 1], [], []>} : vector<8x256xbf16>, vector<256x256xbf16>, vector<8x256xf32> -> vector<8x256xf32>
    %cst_13 = arith.constant 3.906250e-03 : f32
    %18 = vector.broadcast %cst_13 : f32 to vector<8x256xf32>
    %19 = arith.mulf %18, %17 : vector<8x256xf32>
    %20 = arith.subf %10, %19 : vector<8x256xf32>
    %21 = arith.truncf %20 : vector<8x256xf32> to vector<8x256xbf16>
    %c0_14 = arith.constant 0 : index
    %c0_15 = arith.constant 0 : index
    %22 = vector.load %arg3[%c0_14, %c0_15] : memref<256x256xbf16, #tpu.memory_space<vmem>>, vector<256x256xbf16>
    %cst_16 = arith.constant dense<0.000000e+00> : vector<8x256xf32>
    %23 = tpu.matmul %21, %22, %cst_16 {dimension_numbers = #tpu.dot_dimension_numbers<[1], [0], [0], [1], [0, 0, 1, 1], [], []>} : vector<8x256xbf16>, vector<256x256xbf16>, vector<8x256xf32> -> vector<8x256xf32>
    %24 = arith.subf %23, %5 : vector<8x256xf32>
    %25 = arith.truncf %24 : vector<8x256xf32> to vector<8x256xbf16>
    %c0_17 = arith.constant 0 : index
    %c0_18 = arith.constant 0 : index
    %26 = vector.load %arg4[%c0_17, %c0_18] : memref<256x256xbf16, #tpu.memory_space<vmem>>, vector<256x256xbf16>
    %cst_19 = arith.constant dense<0.000000e+00> : vector<8x256xf32>
    %27 = tpu.matmul %25, %26, %cst_19 {dimension_numbers = #tpu.dot_dimension_numbers<[1], [0], [0], [1], [0, 0, 1, 1], [], []>} : vector<8x256xbf16>, vector<256x256xbf16>, vector<8x256xf32> -> vector<8x256xf32>
    %cst_20 = arith.constant 3.906250e-03 : f32
    %28 = vector.broadcast %cst_20 : f32 to vector<8x256xf32>
    %29 = arith.mulf %28, %27 : vector<8x256xf32>
    %30 = arith.subf %20, %29 : vector<8x256xf32>
    %c0_21 = arith.constant 0 : index
    %c0_22 = arith.constant 0 : index
    %31 = vector.load %arg5[%c0_21, %c0_22] : memref<8x256xf32, #tpu.memory_space<vmem>>, vector<8x256xf32>
    tpu.vector_store %arg5[%c0_21, %c0_22], %30 {strides = array<i32>} : memref<8x256xf32, #tpu.memory_space<vmem>>, vector<8x256xf32>,
    return
  }
  func.func @transform_0(%arg0: i32) -> (i32, i32) {
    %c0_i32 = arith.constant 0 : i32
    %c0_i32_0 = arith.constant 0 : i32
    return %arg0, %c0_i32 : i32, i32
  }
  func.func @transform_1(%arg0: i32) -> (i32, i32) {
    %c0_i32 = arith.constant 0 : i32
    %c0_i32_0 = arith.constant 0 : i32
    %c0_i32_1 = arith.constant 0 : i32
    return %c0_i32, %c0_i32_0 : i32, i32
  }
  func.func @transform_2(%arg0: i32) -> (i32, i32) {
    %c0_i32 = arith.constant 0 : i32
    %c0_i32_0 = arith.constant 0 : i32
    %c0_i32_1 = arith.constant 0 : i32
    return %c0_i32, %c0_i32_0 : i32, i32
  }
  func.func @transform_3(%arg0: i32) -> (i32, i32) {
    %c0_i32 = arith.constant 0 : i32
    %c0_i32_0 = arith.constant 0 : i32
    %c0_i32_1 = arith.constant 0 : i32
    return %c0_i32, %c0_i32_0 : i32, i32
  }
  func.func @transform_4(%arg0: i32) -> (i32, i32) {
    %c0_i32 = arith.constant 0 : i32
    %c0_i32_0 = arith.constant 0 : i32
    return %arg0, %c0_i32 : i32, i32
  }
}

module attributes {stable_mosaic.version = 11 : i64} {
  func.func @_lpgd_kernel(%arg0: i32, %arg1: memref<8x256xf32, #tpu.memory_space<vmem>>, %arg2: memref<1x256xf32, #tpu.memory_space<vmem>>, %arg3: memref<256x256xbf16, #tpu.memory_space<vmem>>, %arg4: memref<256x256xbf16, #tpu.memory_space<vmem>>, %arg5: memref<8x256xf32, #tpu.memory_space<vmem>>) attributes {dimension_semantics = [#tpu.dimension_semantics<parallel>], iteration_bounds = array<i64: 1>, scalar_prefetch = 0 : i64, scratch_operands = 0 : i64, tpu.core_type = #tpu.core_type<tc>, window_params = [{transform_indices = @transform_0, window_bounds = array<i64: 8, 256>}, {pipeline_mode = #tpu.pipeline_mode<synchronous>, transform_indices = @transform_1, window_bounds = array<i64: 1, 256>}, {pipeline_mode = #tpu.pipeline_mode<synchronous>, transform_indices = @transform_2, window_bounds = array<i64: 256, 256>}, {pipeline_mode = #tpu.pipeline_mode<synchronous>, transform_indices = @transform_3, window_bounds = array<i64: 256, 256>}, {transform_indices = @transform_4, window_bounds = array<i64: 8, 256>}]} {
    %c0 = arith.constant 0 : index
    %c0_0 = arith.constant 0 : index
    %0 = vector.load %arg1[%c0, %c0_0] : memref<8x256xf32, #tpu.memory_space<vmem>>, vector<8x256xf32>
    %cst = arith.constant 2.000000e+00 : f32
    %1 = vector.broadcast %cst : f32 to vector<8x256xf32>
    %2 = arith.mulf %1, %0 : vector<8x256xf32>
    %c0_1 = arith.constant 0 : index
    %c0_2 = arith.constant 0 : index
    %3 = vector.load %arg2[%c0_1, %c0_2] : memref<1x256xf32, #tpu.memory_space<vmem>>, vector<1x256xf32>
    %4 = vector.broadcast %3 : vector<1x256xf32> to vector<8x256xf32>
    %5 = arith.subf %2, %4 : vector<8x256xf32>
    %6 = arith.truncf %5 : vector<8x256xf32> to vector<8x256xbf16>
    %c0_3 = arith.constant 0 : index
    %c0_4 = arith.constant 0 : index
    %7 = vector.load %arg4[%c0_3, %c0_4] : memref<256x256xbf16, #tpu.memory_space<vmem>>, vector<256x256xbf16>
    %cst_5 = arith.constant dense<0.000000e+00> : vector<8x256xf32>
    %8 = tpu.matmul %6, %7, %cst_5 {dimension_numbers = #tpu.dot_dimension_numbers<[1], [0], [0], [1], [0, 0, 1, 1], [], []>} : vector<8x256xbf16>, vector<256x256xbf16>, vector<8x256xf32> -> vector<8x256xf32>
    %cst_6 = arith.constant 3.906250e-03 : f32
    %9 = vector.broadcast %cst_6 : f32 to vector<8x256xf32>
    %10 = arith.mulf %9, %8 : vector<8x256xf32>
    %11 = arith.truncf %10 : vector<8x256xf32> to vector<8x256xbf16>
    %c0_7 = arith.constant 0 : index
    %c0_8 = arith.constant 0 : index
    %12 = vector.load %arg3[%c0_7, %c0_8] : memref<256x256xbf16, #tpu.memory_space<vmem>>, vector<256x256xbf16>
    %cst_9 = arith.constant dense<0.000000e+00> : vector<8x256xf32>
    %13 = tpu.matmul %11, %12, %cst_9 {dimension_numbers = #tpu.dot_dimension_numbers<[1], [0], [0], [1], [0, 0, 1, 1], [], []>} : vector<8x256xbf16>, vector<256x256xbf16>, vector<8x256xf32> -> vector<8x256xf32>
    %14 = arith.subf %13, %5 : vector<8x256xf32>
    %15 = arith.truncf %14 : vector<8x256xf32> to vector<8x256xbf16>
    %c0_10 = arith.constant 0 : index
    %c0_11 = arith.constant 0 : index
    %16 = vector.load %arg4[%c0_10, %c0_11] : memref<256x256xbf16, #tpu.memory_space<vmem>>, vector<256x256xbf16>
    %cst_12 = arith.constant dense<0.000000e+00> : vector<8x256xf32>
    %17 = tpu.matmul %15, %16, %cst_12 {dimension_numbers = #tpu.dot_dimension_numbers<[1], [0], [0], [1], [0, 0, 1, 1], [], []>} : vector<8x256xbf16>, vector<256x256xbf16>, vector<8x256xf32> -> vector<8x256xf32>
    %cst_13 = arith.constant 3.906250e-03 : f32
    %18 = vector.broadcast %cst_13 : f32 to vector<8x256xf32>
    %19 = arith.mulf %18, %17 : vector<8x256xf32>
    %20 = arith.subf %10, %19 : vector<8x256xf32>
    %21 = arith.truncf %20 : vector<8x256xf32> to vector<8x256xbf16>
    %c0_14 = arith.constant 0 : index
    %c0_15 = arith.constant 0 : index
    %22 = vector.load %arg3[%c0_14, %c0_15] : memref<256x256xbf16, #tpu.memory_space<vmem>>, vector<256x256xbf16>
    %cst_16 = arith.constant dense<0.000000e+00> : vector<8x256xf32>
    %23 = tpu.matmul %21, %22, %cst_16 {dimension_numbers = #tpu.dot_dimension_numbers<[1], [0], [0], [1], [0, 0, 1, 1], [], []>} : vector<8x256xbf16>, vector<256x256xbf16>, vector<8x256xf32> -> vector<8x256xf32>
    %24 = arith.subf %23, %5 : vector<8x256xf32>
    %25 = arith.truncf %24 : vector<8x256xf32> to vector<8x256xbf16>
    %c0_17 = arith.constant 0 : index
    %c0_18 = arith.constant 0 : index
    %26 = vector.load %arg4[%c0_17, %c0_18] : memref<256x256xbf16, #tpu.memory_space<vmem>>, vector<256x256xbf16>
    %cst_19 = arith.constant dense<0.000000e+00> : vector<8x256xf32>
    %27 = tpu.matmul %25, %26, %cst_19 {dimension_numbers = #tpu.dot_dimension_numbers<[1], [0], [0], [1], [0, 0, 1, 1], [], []>} : vector<8x256xbf16>, vector<256x256xbf16>, vector<8x256xf32> -> vector<8x256xf32>
    %cst_20 = arith.constant 3.906250e-03 : f32
    %28 = vector.broadcast %cst_20 : f32 to vector<8x256xf32>
    %29 = arith.mulf %28, %27 : vector<8x256xf32>
    %30 = arith.subf %20, %29 : vector<8x256xf32>
    %c0_21 = arith.constant 0 : index
    %c0_22 = arith.constant 0 : index
    %31 = vector.load %arg5[%c0_21, %c0_22] : memref<8x256xf32, #tpu.memory_space<vmem>>, vector<8x256xf32>
    tpu.vector_store %arg5[%c0_21, %c0_22], %30 {strides = array<i32>} : memref<8x256xf32, #tpu.memory_space<vmem>>, vector<8x256xf32>,
    return
  }
  func.func @transform_0(%arg0: i32) -> (i32, i32) {
    %c0_i32 = arith.constant 0 : i32
    %c0_i32_0 = arith.constant 0 : i32
    return %arg0, %c0_i32 : i32, i32
  }
  func.func @transform_1(%arg0: i32) -> (i32, i32) {
    %c0_i32 = arith.constant 0 : i32
    %c0_i32_0 = arith.constant 0 : i32
    %c0_i32_1 = arith.constant 0 : i32
    return %c0_i32, %c0_i32_0 : i32, i32
  }
  func.func @transform_2(%arg0: i32) -> (i32, i32) {
    %c0_i32 = arith.constant 0 : i32
    %c0_i32_0 = arith.constant 0 : i32
    %c0_i32_1 = arith.constant 0 : i32
    return %c0_i32, %c0_i32_0 : i32, i32
  }
  func.func @transform_3(%arg0: i32) -> (i32, i32) {
    %c0_i32 = arith.constant 0 : i32
    %c0_i32_0 = arith.constant 0 : i32
    %c0_i32_1 = arith.constant 0 : i32
    return %c0_i32, %c0_i32_0 : i32, i32
  }
  func.func @transform_4(%arg0: i32) -> (i32, i32) {
    %c0_i32 = arith.constant 0 : i32
    %c0_i32_0 = arith.constant 0 : i32
    return %arg0, %c0_i32 : i32, i32
  }
}

</mosaic_0001>

<bundles_post_ra>
// kernel: tpu_custom_call.1
= control target key start
LH: loop header
LB: loop body
LE: loop exit
PB: predicated region body
PF: predicated region fallthrough
CT: control target
= control target key end

     0   :  { %9 = vsyncpa [#allocation3], 0  ;;  %s1360_s0 = inlined_call_operand.hbm [shape: f32[8,256], index: 0, kind: input, shape index: {}]   ;;  %s1361_s1 = inlined_call_operand.vmem [shape: f32[1,256], index: 1, kind: input, shape index: {}]   ;;  %s1362_s2 = inlined_call_operand.hbm [shape: bf16[256,256], index: 2, kind: input, shape index: {}]   ;;  %s1363_s3 = inlined_call_operand.hbm [shape: bf16[256,256], index: 3, kind: input, shape index: {}]   ;;  %s1364_s4 = inlined_call_operand.hbm [shape: f32[8,256], index: 4, kind: output, shape index: {}]  }
   0x1   :  { %10 = vsyncpa [#allocation6], 0 }
   0x2   :  { %11 = vsyncpa [#allocation4], 0  ;;  %s966_s15 = smov [#allocation5]   ;;  %s872_s19 = scalar_lea.hbm %s1362_s2, 4096 }
   0x3   :  { %s29_s16 = sshll.u32 %s966_s15, 4  ;;  %p873_p0 = scmp.ne.s32.totalorder %s1362_s2, %s872_s19  ;;  %s30_s16 = int_to_ptr.vmem [resolvable:$true] %s29_s16 }
   0x4   :  { %p876_p1 = scmp.lt.u32.totalorder %s872_s19, %s1362_s2 }
   0x6   :  { %p878_p2 = pnand %p876_p1, %p873_p0 }
   0x8   :  { %881 = shalt.err (!%p878_p2)
}
   0x9   :  { %s882_s24 = scalar_lea.vmem %s30_s16, 4096  ;;  %p887_p4 = scmp.lt.s32.totalorder %s30_s16, %s30_s16 }
   0xa   :  { %p883_p3 = scmp.ne.s32.totalorder %s30_s16, %s882_s24  ;;  %p888_p5 = scmp.lt.s32.totalorder %s882_s24, %s882_s24 }
   0xc   :  { %p889_p6 = por %p888_p5, %p887_p4 }
   0xe   :  { %p890_p7 = pnand %p889_p6, %p883_p3 }
  0x10   :  { %893 = shalt.err (!%p890_p7)
}
  0x11   :  { %s967_s25 = smov 128   ;;  %s968_s26 = smov 8  }
  0x12   :  { %35 = dma.hbm_to_vmem [thread:$0]  %s1362_s2, 4096, %s30_s16, [#allocation6], %s967_s25, %s967_s25, %s968_s26  }
  0x13   :  { %s969_s29 = smov [#allocation2]   ;;  %s970_s5 = smov [#allocation7]  }
  0x14   :  { %s18_s30 = sshll.u32 %s969_s29, 4  ;;  %s41_s6 = sshll.u32 %s970_s5, 4  ;;  %s19_s30 = int_to_ptr.vmem [resolvable:$true] %s18_s30  ;;  %s42_s6 = int_to_ptr.vmem [resolvable:$true] %s41_s6 }
  0x15   :  { %s894_s9 = scalar_lea.hbm %s1360_s0, 256 }
  0x16   :  { %p895_p8 = scmp.ne.s32.totalorder %s1360_s0, %s894_s9  ;;  %p898_p9 = scmp.lt.u32.totalorder %s894_s9, %s1360_s0 }
  0x18   :  { %p900_p10 = pnand %p898_p9, %p895_p8 }
  0x1a   :  { %903 = shalt.err (!%p900_p10)
}
  0x1b   :  { %s904_s2 = scalar_lea.vmem %s19_s30, 256  ;;  %p909_p12 = scmp.lt.s32.totalorder %s19_s30, %s19_s30 }
  0x1c   :  { %p905_p11 = scmp.ne.s32.totalorder %s19_s30, %s904_s2  ;;  %p910_p13 = scmp.lt.s32.totalorder %s904_s2, %s904_s2 }
  0x1e   :  { %p911_p0 = por %p910_p13, %p909_p12 }
  0x20   :  { %p912_p1 = pnand %p911_p0, %p905_p11 }
  0x22   :  { %915 = shalt.err (!%p912_p1)
}
  0x23   :  { %21 = dma.hbm_to_vmem [thread:$0]  %s1360_s0, 256, %s19_s30, [#allocation3]  }
  0x24   :  { %s916_s18 = scalar_lea.hbm %s1363_s3, 4096 }
  0x25   :  { %p917_p2 = scmp.ne.s32.totalorder %s1363_s3, %s916_s18  ;;  %p920_p3 = scmp.lt.u32.totalorder %s916_s18, %s1363_s3 }
  0x27   :  { %p922_p4 = pnand %p920_p3, %p917_p2 }
  0x29   :  { %925 = shalt.err (!%p922_p4)
}
  0x2a   :  { %s926_s23 = scalar_lea.vmem %s42_s6, 4096  ;;  %p931_p6 = scmp.lt.s32.totalorder %s42_s6, %s42_s6 }
  0x2b   :  { %p927_p5 = scmp.ne.s32.totalorder %s42_s6, %s926_s23  ;;  %p932_p7 = scmp.lt.s32.totalorder %s926_s23, %s926_s23 }
  0x2d   :  { %p933_p8 = por %p932_p7, %p931_p6 }
  0x2f   :  { %p934_p9 = pnand %p933_p8, %p927_p5 }
  0x31   :  { %937 = shalt.err (!%p934_p9)
}
  0x32   :  { %47 = dma.hbm_to_vmem [thread:$0]  %s1363_s3, 4096, %s42_s6, [#allocation6], %s967_s25, %s967_s25, %s968_s26  }
  0x33   :  { %960 = dma.done.wait [#allocation3], 256  }
  0x34   :  { %961 = vsyncadd [#allocation3], 4294967040 }
  0x35   :  { %962 = dma.done.wait [#allocation6], 8192  }
  0x36   :  { %963 = vsyncadd [#allocation6], 4294959104  ;;  %v1039_v0 = vld [vmem:[#allocation7 + $0x4] ss:$8 sps:$4 sm:$0xff]   ;;  %v1041_v1 = vld [vmem:[#allocation7] ss:$8 sps:$4 sm:$0xff]   ;;  %v63_v7 = vlaneseq }
  0x37   :  { %269 = vmatprep.subr.bf16.mxu0 %v1039_v0  ;;  %v1044_v2 = vld [vmem:[#allocation7 + $0x14] ss:$8 sps:$4 sm:$0xff]   ;;  %v1047_v3 = vld [vmem:[#allocation7 + $0x10] ss:$8 sps:$4 sm:$0xff]   ;;  %v1050_v4 = vld [vmem:[#allocation7 + $0x24] ss:$8 sps:$4 sm:$0xff]  }
  0x38   :  { %270 = vmatpush1.bf16.msra.mxu0 %v1041_v1  ;;  %v1053_v5 = vld [vmem:[#allocation7 + $0x20] ss:$8 sps:$4 sm:$0xff]   ;;  %v1056_v6 = vld [vmem:[#allocation7 + $0x34] ss:$8 sps:$4 sm:$0xff]   ;;  %v1059_v8 = vld [vmem:[#allocation7 + $0x30] ss:$8 sps:$4 sm:$0xff]  }
  0x39   :  { %271 = vmatprep.subr.bf16.mxu0 %v1044_v2  ;;  %v1062_v9 = vld [vmem:[#allocation7 + $0x44] ss:$8 sps:$4 sm:$0xff]   ;;  %v1064_v10 = vshrl.u32 %v63_v7, 7  ;;  %v1067_v11 = vld [vmem:[#allocation7 + $0x40] ss:$8 sps:$4 sm:$0xff]   ;;  %v58_v16 = vld [vmem:[#allocation2 + $0x8] sm:$0xff] }
  0x3a   :  { %v1070_v12 = vld [vmem:[#allocation7 + $0x54] ss:$8 sps:$4 sm:$0xff]   ;;  %v1074_v14 = vld [vmem:[#allocation7 + $0x50] ss:$8 sps:$4 sm:$0xff]   ;;  %v1077_v15 = vld [vmem:[#allocation7 + $0x64] ss:$8 sps:$4 sm:$0xff]  }
  0x3b   :  { %v69_v13 = vsub.s32 1, %v1064_v10  ;;  %v1082_v17 = vld [vmem:[%s1361_s1] sm:$0x3]  ;;  %v1084_v18 = vld [vmem:[#allocation7 + $0x60] ss:$8 sps:$4 sm:$0xff]   ;;  %v60_v19 = vmul.f32 2.0, %v58_v16 }
  0x3c   :  { %272 = vmatpush1.bf16.msra.mxu0 %v1047_v3  ;;  %v1088_v21 = vld [vmem:[#allocation5 + $0x4] ss:$8 sps:$4 sm:$0xff]   ;;  %v1090_v22 = vld [vmem:[#allocation5] ss:$8 sps:$4 sm:$0xff]   ;;  %v1093_v23 = vld [vmem:[#allocation7 + $0x74] ss:$8 sps:$4 sm:$0xff]  }
  0x3d   :  { %273 = vmatprep.subr.bf16.mxu0 %v1050_v4  ;;  %v70_v20 = vrot.slane %v1082_v17, %v69_v13  ;;  %v1097_v25 = vld [vmem:[#allocation5 + $0x14] ss:$8 sps:$4 sm:$0xff]   ;;  %506 = vmatprep.subr.bf16.mxu1 %v1088_v21  ;;  %v1103_v27 = vld [vmem:[#allocation5 + $0x10] ss:$8 sps:$4 sm:$0xff]   ;;  %v1109_v29 = vld [vmem:[#allocation5 + $0x24] ss:$8 sps:$4 sm:$0xff]  }
  0x3e   :  { %507 = vmatpush1.bf16.msra.mxu1 %v1090_v22  ;;  %v1106_v28 = vld [vmem:[#allocation7 + $0x70] ss:$8 sps:$4 sm:$0xff]   ;;  %v1112_v30 = vld [vmem:[#allocation7 + $0x84] ss:$8 sps:$4 sm:$0xff]   ;;  %v1115_v31 = vld [vmem:[#allocation5 + $0x20] ss:$8 sps:$4 sm:$0xff]  }
  0x3f   :  { %v1095_v24 = vsub.f32 %v60_v19, %v70_v20  ;;  %508 = vmatprep.subr.bf16.mxu1 %v1097_v25  ;;  %v1118_v32 = vld [vmem:[#allocation7 + $0x80] ss:$8 sps:$4 sm:$0xff]   ;;  %v1121_v33 = vld [vmem:[#allocation5 + $0x34] ss:$8 sps:$4 sm:$0xff]   ;;  %v1127_v35 = vld [vmem:[#allocation5 + $0x30] ss:$8 sps:$4 sm:$0xff]  }
  0x40   :  { %274 = vmatpush1.bf16.msra.mxu0 %v1053_v5  ;;  %v1124_v34 = vld [vmem:[#allocation7 + $0x94] ss:$8 sps:$4 sm:$0xff]   ;;  %v1130_v36 = vld [vmem:[#allocation7 + $0x90] ss:$8 sps:$4 sm:$0xff]   ;;  %v1133_v37 = vld [vmem:[#allocation5 + $0x44] ss:$8 sps:$4 sm:$0xff]  }
  0x41   :  { %275 = vmatprep.subr.bf16.mxu0 %v1056_v6  ;;  %v76_v26 = vpack.c.bf16 %v1095_v24, %v1095_v24  ;;  %v1136_v38 = vld [vmem:[#allocation7 + $0xa4] ss:$8 sps:$4 sm:$0xff]   ;;  %v1139_v39 = vld [vmem:[#allocation5 + $0x40] ss:$8 sps:$4 sm:$0xff]   ;;  %v1145_v41 = vld [vmem:[#allocation5 + $0x54] ss:$8 sps:$4 sm:$0xff]  }
  0x42   :  { %509 = vmatpush1.bf16.msra.mxu1 %v1103_v27  ;;  %v1142_v40 = vld [vmem:[#allocation7 + $0xa0] ss:$8 sps:$4 sm:$0xff]   ;;  %v1148_v42 = vld [vmem:[#allocation7 + $0xb4] ss:$8 sps:$4 sm:$0xff]   ;;  %v1151_v43 = vld [vmem:[#allocation5 + $0x50] ss:$8 sps:$4 sm:$0xff]  }
  0x43   :  { %301 = vmatprep.mubr.bf16.mxu0 %v76_v26  ;;  %510 = vmatprep.subr.bf16.mxu1 %v1109_v29  ;;  %v1154_v44 = vld [vmem:[#allocation7 + $0xb0] ss:$8 sps:$4 sm:$0xff]   ;;  %v1157_v45 = vld [vmem:[#allocation5 + $0x64] ss:$8 sps:$4 sm:$0xff]   ;;  %v1163_v47 = vld [vmem:[#allocation5 + $0x60] ss:$8 sps:$4 sm:$0xff]  }
  0x44   :  { %276 = vmatpush1.bf16.msra.mxu0 %v1059_v8  ;;  %1374 = vst [vmem:[#allocation12_spill] sm:$0xff] %v1154_v44  ;;  %v1160_v46 = vld [vmem:[#allocation7 + $0xc4] ss:$8 sps:$4 sm:$0xff]   ;;  %v1166_v48 = vld [vmem:[#allocation7 + $0xc0] ss:$8 sps:$4 sm:$0xff]   ;;  %v65_v51 = vsub.s32 0, %v1064_v10 }
  0x45   :  { %277 = vmatprep.subr.bf16.mxu0 %v1062_v9  ;;  %1375 = vst [vmem:[#allocation13_spill] sm:$0xff] %v1160_v46  ;;  %1376 = vst [vmem:[#allocation14_spill] sm:$0xff] %v1166_v48  ;;  %v1169_v49 = vld [vmem:[#allocation5 + $0x74] ss:$8 sps:$4 sm:$0xff]   ;;  %v1176_v52 = vld [vmem:[#allocation5 + $0x70] ss:$8 sps:$4 sm:$0xff]  }
  0x46   :  { %511 = vmatpush1.bf16.msra.mxu1 %v1115_v31  ;;  %v1172_v50 = vld [vmem:[#allocation7 + $0xd4] ss:$8 sps:$4 sm:$0xff]   ;;  %v1179_v53 = vld [vmem:[#allocation7 + $0xd0] ss:$8 sps:$4 sm:$0xff]   ;;  %v1182_v55 = vld [vmem:[#allocation5 + $0x84] ss:$8 sps:$4 sm:$0xff]   ;;  %v66_v57 = vrot.slane %v1082_v17, %v65_v51 }
  0x47   :  { %512 = vmatprep.subr.bf16.mxu1 %v1121_v33  ;;  %1377 = vst [vmem:[#allocation15_spill] sm:$0xff] %v1172_v50  ;;  %1378 = vst [vmem:[#allocation16_spill] sm:$0xff] %v1179_v53  ;;  %v57_v54 = vld [vmem:[#allocation2] sm:$0xff]  ;;  %v1185_v56 = vld [vmem:[#allocation7 + $0xe4] ss:$8 sps:$4 sm:$0xff]   ;;  %s971_s1 = smov [#allocation8]  }
  0x48   :  { %278 = vmatpush1.bf16.msra.mxu0 %v1067_v11  ;;  %1379 = vst [vmem:[#allocation17_spill] sm:$0xff] %v1185_v56  ;;  %v59_v58 = vmul.f32 2.0, %v57_v54  ;;  %v1189_v59 = vld [vmem:[#allocation5 + $0x80] ss:$8 sps:$4 sm:$0xff]   ;;  %v1195_v61 = vld [vmem:[#allocation5 + $0x94] ss:$8 sps:$4 sm:$0xff]  }
  0x49   :  { %279 = vmatprep.subr.bf16.mxu0 %v1070_v12  ;;  %v1192_v60 = vld [vmem:[#allocation7 + $0xe0] ss:$8 sps:$4 sm:$0xff]   ;;  %v1198_v62 = vld [vmem:[#allocation7 + $0xf4] ss:$8 sps:$4 sm:$0xff]   ;;  %v1203_v7 = vld [vmem:[#allocation5 + $0x90] ss:$8 sps:$4 sm:$0xff]  }
  0x4a   :  { %513 = vmatpush1.bf16.msra.mxu1 %v1127_v35  ;;  %1380 = vst [vmem:[#allocation18_spill] sm:$0xff] %v1192_v60  ;;  %1381 = vst [vmem:[#allocation19_spill] sm:$0xff] %v1198_v62  ;;  %v1200_v63 = vsub.f32 %v59_v58, %v66_v57  ;;  %v1206_v10 = vld [vmem:[#allocation7 + $0xf0] ss:$8 sps:$4 sm:$0xff]   ;;  %v1209_v13 = vld [vmem:[#allocation5 + $0xa4] ss:$8 sps:$4 sm:$0xff]  }
  0x4b   :  { %514 = vmatprep.subr.bf16.mxu1 %v1133_v37  ;;  %1382 = vst [vmem:[#allocation20_spill] sm:$0xff] %v1206_v10  ;;  %v1215_v17 = vld [vmem:[#allocation5 + $0xa0] ss:$8 sps:$4 sm:$0xff]   ;;  %v1219_v19 = vld [vmem:[#allocation5 + $0xb4] ss:$8 sps:$4 sm:$0xff]   ;;  %s696_s26 = sshll.u32 %s971_s1, 4  ;;  %s697_s26 = int_to_ptr.vmem [resolvable:$true] %s696_s26 }
  0x4c   :  { %280 = vmatpush1.bf16.msra.mxu0 %v1074_v14  ;;  %v75_v16 = vpack.c.bf16 %v1200_v63, %v1200_v63  ;;  %v1223_v20 = vld [vmem:[#allocation5 + $0xb0] ss:$8 sps:$4 sm:$0xff]   ;;  %v1226_v26 = vld [vmem:[#allocation5 + $0xc4] ss:$8 sps:$4 sm:$0xff]   ;;  %v1231_v51 = vld [vmem:[#allocation5 + $0xc0] ss:$8 sps:$4 sm:$0xff]   ;;  %p943_p11 = scmp.lt.s32.totalorder %s697_s26, %s697_s26 }
  0x4d   :  { %281 = vmatprep.subr.bf16.mxu0 %v1077_v15  ;;  %v1234_v54 = vld [vmem:[#allocation5 + $0xd4] ss:$8 sps:$4 sm:$0xff]   ;;  %v1239_v57 = vld [vmem:[#allocation5 + $0xd0] ss:$8 sps:$4 sm:$0xff]   ;;  %v1242_v58 = vld [vmem:[#allocation5 + $0xe4] ss:$8 sps:$4 sm:$0xff]  }
  0x4e   :  { %515 = vmatpush1.bf16.msra.mxu1 %v1139_v39  ;;  %s938_s27 = scalar_lea.vmem %s697_s26, 256 }
  0x4f   :  { %516 = vmatprep.subr.bf16.mxu1 %v1145_v41  ;;  %p939_p10 = scmp.ne.s32.totalorder %s697_s26, %s938_s27  ;;  %p944_p12 = scmp.lt.s32.totalorder %s938_s27, %s938_s27 }
  0x50   :  { %282 = vmatpush1.bf16.msra.mxu0 %v1084_v18 }
  0x51   :  { %283 = vmatprep.subr.bf16.mxu0 %v1093_v23  ;;  %p945_p13 = por %p944_p12, %p943_p11 }
  0x52   :  { %517 = vmatpush1.bf16.msra.mxu1 %v1151_v43 }
  0x53   :  { %518 = vmatprep.subr.bf16.mxu1 %v1157_v45  ;;  %p946_p0 = pnand %p945_p13, %p939_p10 }
  0x54   :  { %284 = vmatpush1.bf16.msra.mxu0 %v1106_v28 }
  0x55   :  { %285 = vmatprep.subr.bf16.mxu0 %v1112_v30 }
  0x56   :  { %519 = vmatpush1.bf16.msra.mxu1 %v1163_v47 }
  0x57   :  { %520 = vmatprep.subr.bf16.mxu1 %v1169_v49 }
  0x58   :  { %286 = vmatpush1.bf16.msra.mxu0 %v1118_v32 }
  0x59   :  { %287 = vmatprep.subr.bf16.mxu0 %v1124_v34 }
  0x5a   :  { %521 = vmatpush1.bf16.msra.mxu1 %v1176_v52 }
  0x5b   :  { %522 = vmatprep.subr.bf16.mxu1 %v1182_v55 }
  0x5c   :  { %288 = vmatpush1.bf16.msra.mxu0 %v1130_v36 }
  0x5d   :  { %289 = vmatprep.subr.bf16.mxu0 %v1136_v38 }
  0x5e   :  { %523 = vmatpush1.bf16.msra.mxu1 %v1189_v59 }
  0x5f   :  { %524 = vmatprep.subr.bf16.mxu1 %v1195_v61 }
  0x60   :  { %290 = vmatpush1.bf16.msra.mxu0 %v1142_v40 }
  0x61   :  { %291 = vmatprep.subr.bf16.mxu0 %v1148_v42 }
  0x62   :  { %525 = vmatpush1.bf16.msra.mxu1 %v1203_v7 }
  0x63   :  { %526 = vmatprep.subr.bf16.mxu1 %v1209_v13 }
  0x64   :  { %292 = vmatpush1.bf16.msra.mxu0 %v1154_v44 }
  0x65   :  { %293 = vmatprep.subr.bf16.mxu0 %v1160_v46 }
  0x66   :  { %527 = vmatpush1.bf16.msra.mxu1 %v1215_v17 }
  0x67   :  { %528 = vmatprep.subr.bf16.mxu1 %v1219_v19 }
  0x68   :  { %294 = vmatpush1.bf16.msra.mxu0 %v1166_v48 }
  0x69   :  { %295 = vmatprep.subr.bf16.mxu0 %v1172_v50 }
  0x6a   :  { %529 = vmatpush1.bf16.msra.mxu1 %v1223_v20 }
  0x6b   :  { %530 = vmatprep.subr.bf16.mxu1 %v1226_v26 }
  0x6c   :  { %296 = vmatpush1.bf16.msra.mxu0 %v1179_v53 }
  0x6d   :  { %297 = vmatprep.subr.bf16.mxu0 %v1185_v56 }
  0x6e   :  { %531 = vmatpush1.bf16.msra.mxu1 %v1231_v51 }
  0x6f   :  { %532 = vmatprep.subr.bf16.mxu1 %v1234_v54 }
  0x70   :  { %298 = vmatpush1.bf16.msra.mxu0 %v1192_v60 }
  0x71   :  { %299 = vmatprep.subr.bf16.mxu0 %v1198_v62 }
  0x72   :  { %533 = vmatpush1.bf16.msra.mxu1 %v1239_v57 }
  0x73   :  { %534 = vmatprep.subr.bf16.mxu1 %v1242_v58 }
  0x74   :  { %300 = vmatpush1.bf16.msra.mxu0 %v1206_v10 }
  0x75   :  { %551 = vmatprep.subr.bf16.mxu0 %v1039_v0 }
  0x77   :  { %302 = vmatmul.mubr.bf16.vlgmr.msra.gmra.mrb[0].mxu0 %v75_v16  ;;  %v868_v16 = vld [vmem:[#allocation5 + $0xe0] ss:$8 sps:$4 sm:$0xff]  }
  0x78   :  { %552 = vmatpush1.bf16.msra.mxu0 %v1041_v1  ;;  %535 = vmatpush1.bf16.msra.mxu1 %v868_v16 }
  0x79   :  { %553 = vmatprep.subr.bf16.mxu0 %v1044_v2 }
  0x7c   :  { %554 = vmatpush1.bf16.msra.mxu0 %v1047_v3 }
  0x7d   :  { %555 = vmatprep.subr.bf16.mxu0 %v1050_v4 }
  0x80   :  { %556 = vmatpush1.bf16.msra.mxu0 %v1053_v5 }
  0x81   :  { %557 = vmatprep.subr.bf16.mxu0 %v1056_v6 }
  0x84   :  { %558 = vmatpush1.bf16.msra.mxu0 %v1059_v8 }
  0x85   :  { %559 = vmatprep.subr.bf16.mxu0 %v1062_v9 }
  0x88   :  { %560 = vmatpush1.bf16.msra.mxu0 %v1067_v11 }
  0x89   :  { %561 = vmatprep.subr.bf16.mxu0 %v1070_v12 }
  0x8c   :  { %562 = vmatpush1.bf16.msra.mxu0 %v1074_v14 }
  0x8d   :  { %563 = vmatprep.subr.bf16.mxu0 %v1077_v15 }
  0x90   :  { %564 = vmatpush1.bf16.msra.mxu0 %v1084_v18 }
  0x91   :  { %565 = vmatprep.subr.bf16.mxu0 %v1093_v23 }
  0x94   :  { %566 = vmatpush1.bf16.msra.mxu0 %v1106_v28 }
  0x95   :  { %567 = vmatprep.subr.bf16.mxu0 %v1112_v30 }
  0x98   :  { %568 = vmatpush1.bf16.msra.mxu0 %v1118_v32 }
  0x99   :  { %569 = vmatprep.subr.bf16.mxu0 %v1124_v34 }
  0x9c   :  { %570 = vmatpush1.bf16.msra.mxu0 %v1130_v36 }
  0x9d   :  { %571 = vmatprep.subr.bf16.mxu0 %v1136_v38 }
  0xa0   :  { %572 = vmatpush1.bf16.msra.mxu0 %v1142_v40 }
  0xa1   :  { %573 = vmatprep.subr.bf16.mxu0 %v1148_v42 }
  0xa4   :  { %574 = vmatpush1.bf16.msra.mxu0 %v1154_v44  ;;  %v869_v44 = vld [vmem:[#allocation5 + $0xf4] ss:$8 sps:$4 sm:$0xff]  }
  0xa5   :  { %575 = vmatprep.subr.bf16.mxu0 %v1160_v46  ;;  %v871_v46 = vld [vmem:[#allocation5 + $0xf0] ss:$8 sps:$4 sm:$0xff]   ;;  %536 = vmatprep.subr.bf16.mxu1 %v869_v44 }
  0xa6   :  { %537 = vmatpush1.bf16.msra.mxu1 %v871_v46 }
  0xa7   :  { %598 = vmatprep.subr.bf16.mxu1 %v1088_v21 }
  0xa8   :  { %576 = vmatpush1.bf16.msra.mxu0 %v1166_v48 }
  0xa9   :  { %577 = vmatprep.subr.bf16.mxu0 %v1172_v50 }
  0xac   :  { %578 = vmatpush1.bf16.msra.mxu0 %v1179_v53 }
  0xad   :  { %579 = vmatprep.subr.bf16.mxu0 %v1185_v56 }
  0xb0   :  { %580 = vmatpush1.bf16.msra.mxu0 %v1192_v60 }
  0xb1   :  { %581 = vmatprep.subr.bf16.mxu0 %v1198_v62 }
  0xb4   :  { %582 = vmatpush1.bf16.msra.mxu0 %v1206_v10 }
  0xb5   :  { %643 = vmatprep.subr.bf16.mxu0 %v1039_v0 }
 0x14a   :  { %v303_v50 = vpop.f32.mrb[0].mxu0 }
 0x14b   :  { %v1275_v53 = vmul.f32 0.00390625, %v303_v50  ;;  %v305_v56 = vpop.f32.mrb[1].mxu0 }
 0x14c   :  { %v1277_v48 = vmul.f32 0.00390625, %v305_v56  ;;  %v307_v60 = vpop.f32.mrb[2].mxu0 }
 0x14d   :  { %v308_v62 = vpop.f32.mrb[3].mxu0  ;;  %v312_v0 = vpack.c.bf16 %v1275_v53, %v1275_v53 }
 0x14e   :  { %v313_v10 = vpack.c.bf16 %v1277_v48, %v1277_v48 }
 0x150   :  { %538 = vmatprep.mubr.bf16.mxu1 %v313_v10 }
 0x151   :  { %539 = vmatmul.mubr.bf16.vlgmr.msra.gmra.mrb[0].mxu1 %v312_v0 }
 0x152   :  { %599 = vmatpush1.bf16.msra.mxu1 %v1090_v22 }
 0x153   :  { %600 = vmatprep.subr.bf16.mxu1 %v1097_v25 }
 0x156   :  { %601 = vmatpush1.bf16.msra.mxu1 %v1103_v27 }
 0x157   :  { %602 = vmatprep.subr.bf16.mxu1 %v1109_v29 }
 0x15a   :  { %603 = vmatpush1.bf16.msra.mxu1 %v1115_v31 }
 0x15b   :  { %604 = vmatprep.subr.bf16.mxu1 %v1121_v33 }
 0x15e   :  { %605 = vmatpush1.bf16.msra.mxu1 %v1127_v35 }
 0x15f   :  { %606 = vmatprep.subr.bf16.mxu1 %v1133_v37 }
 0x162   :  { %607 = vmatpush1.bf16.msra.mxu1 %v1139_v39 }
 0x163   :  { %608 = vmatprep.subr.bf16.mxu1 %v1145_v41 }
 0x166   :  { %609 = vmatpush1.bf16.msra.mxu1 %v1151_v43 }
 0x167   :  { %610 = vmatprep.subr.bf16.mxu1 %v1157_v45 }
 0x16a   :  { %611 = vmatpush1.bf16.msra.mxu1 %v1163_v47 }
 0x16b   :  { %612 = vmatprep.subr.bf16.mxu1 %v1169_v49 }
 0x16e   :  { %613 = vmatpush1.bf16.msra.mxu1 %v1176_v52 }
 0x16f   :  { %614 = vmatprep.subr.bf16.mxu1 %v1182_v55 }
 0x172   :  { %615 = vmatpush1.bf16.msra.mxu1 %v1189_v59 }
 0x173   :  { %616 = vmatprep.subr.bf16.mxu1 %v1195_v61 }
 0x176   :  { %617 = vmatpush1.bf16.msra.mxu1 %v1203_v7 }
 0x177   :  { %618 = vmatprep.subr.bf16.mxu1 %v1209_v13 }
 0x17a   :  { %619 = vmatpush1.bf16.msra.mxu1 %v1215_v17 }
 0x17b   :  { %620 = vmatprep.subr.bf16.mxu1 %v1219_v19 }
 0x17e   :  { %621 = vmatpush1.bf16.msra.mxu1 %v1223_v20 }
 0x17f   :  { %622 = vmatprep.subr.bf16.mxu1 %v1226_v26 }
 0x182   :  { %623 = vmatpush1.bf16.msra.mxu1 %v1231_v51 }
 0x183   :  { %624 = vmatprep.subr.bf16.mxu1 %v1234_v54 }
 0x186   :  { %625 = vmatpush1.bf16.msra.mxu1 %v1239_v57 }
 0x187   :  { %626 = vmatprep.subr.bf16.mxu1 %v1242_v58 }
 0x18a   :  { %627 = vmatpush1.bf16.msra.mxu1 %v868_v16 }
 0x18b   :  { %628 = vmatprep.subr.bf16.mxu1 %v869_v44 }
 0x18e   :  { %629 = vmatpush1.bf16.msra.mxu1 %v871_v46 }
 0x224   :  { %v540_v21 = vpop.f32.mrb[0].mxu1 }
 0x225   :  { %v547_v22 = vsub.f32 %v540_v21, %v1200_v63  ;;  %v542_v25 = vpop.f32.mrb[1].mxu1 }
 0x226   :  { %v548_v27 = vsub.f32 %v542_v25, %v1095_v24  ;;  %v544_v29 = vpop.f32.mrb[2].mxu1 }
 0x227   :  { %v545_v31 = vpop.f32.mrb[3].mxu1  ;;  %v549_v35 = vpack.c.bf16 %v547_v22, %v547_v22 }
 0x228   :  { %v550_v33 = vpack.c.bf16 %v548_v27, %v548_v27 }
 0x22a   :  { %583 = vmatprep.mubr.bf16.mxu0 %v550_v33 }
 0x22b   :  { %584 = vmatmul.mubr.bf16.vlgmr.msra.gmra.mrb[4].mxu0 %v549_v35 }
 0x22c   :  { %644 = vmatpush1.bf16.msra.mxu0 %v1041_v1  ;;  %v1383_v1 = vld [vmem:[#allocation12_spill] sm:$0xff] }
 0x22d   :  { %645 = vmatprep.subr.bf16.mxu0 %v1044_v2  ;;  %v1384_v2 = vld [vmem:[#allocation13_spill] sm:$0xff] }
 0x230   :  { %646 = vmatpush1.bf16.msra.mxu0 %v1047_v3  ;;  %v1385_v3 = vld [vmem:[#allocation14_spill] sm:$0xff] }
 0x231   :  { %647 = vmatprep.subr.bf16.mxu0 %v1050_v4  ;;  %v1386_v4 = vld [vmem:[#allocation15_spill] sm:$0xff] }
 0x234   :  { %648 = vmatpush1.bf16.msra.mxu0 %v1053_v5  ;;  %v1387_v5 = vld [vmem:[#allocation16_spill] sm:$0xff] }
 0x235   :  { %649 = vmatprep.subr.bf16.mxu0 %v1056_v6  ;;  %v1388_v6 = vld [vmem:[#allocation17_spill] sm:$0xff] }
 0x238   :  { %650 = vmatpush1.bf16.msra.mxu0 %v1059_v8  ;;  %v1389_v8 = vld [vmem:[#allocation18_spill] sm:$0xff] }
 0x239   :  { %651 = vmatprep.subr.bf16.mxu0 %v1062_v9  ;;  %v1390_v9 = vld [vmem:[#allocation19_spill] sm:$0xff] }
 0x23c   :  { %652 = vmatpush1.bf16.msra.mxu0 %v1067_v11  ;;  %v1391_v11 = vld [vmem:[#allocation20_spill] sm:$0xff] }
 0x23d   :  { %653 = vmatprep.subr.bf16.mxu0 %v1070_v12 }
 0x240   :  { %654 = vmatpush1.bf16.msra.mxu0 %v1074_v14 }
 0x241   :  { %655 = vmatprep.subr.bf16.mxu0 %v1077_v15 }
 0x244   :  { %656 = vmatpush1.bf16.msra.mxu0 %v1084_v18 }
 0x245   :  { %657 = vmatprep.subr.bf16.mxu0 %v1093_v23 }
 0x248   :  { %658 = vmatpush1.bf16.msra.mxu0 %v1106_v28 }
 0x249   :  { %659 = vmatprep.subr.bf16.mxu0 %v1112_v30 }
 0x24c   :  { %660 = vmatpush1.bf16.msra.mxu0 %v1118_v32 }
 0x24d   :  { %661 = vmatprep.subr.bf16.mxu0 %v1124_v34 }
 0x250   :  { %662 = vmatpush1.bf16.msra.mxu0 %v1130_v36 }
 0x251   :  { %663 = vmatprep.subr.bf16.mxu0 %v1136_v38 }
 0x254   :  { %664 = vmatpush1.bf16.msra.mxu0 %v1142_v40 }
 0x255   :  { %665 = vmatprep.subr.bf16.mxu0 %v1148_v42 }
 0x258   :  { %666 = vmatpush1.bf16.msra.mxu0 %v1383_v1 }
 0x259   :  { %667 = vmatprep.subr.bf16.mxu0 %v1384_v2 }
 0x25c   :  { %668 = vmatpush1.bf16.msra.mxu0 %v1385_v3 }
 0x25d   :  { %669 = vmatprep.subr.bf16.mxu0 %v1386_v4 }
 0x260   :  { %670 = vmatpush1.bf16.msra.mxu0 %v1387_v5 }
 0x261   :  { %671 = vmatprep.subr.bf16.mxu0 %v1388_v6 }
 0x264   :  { %672 = vmatpush1.bf16.msra.mxu0 %v1389_v8 }
 0x265   :  { %673 = vmatprep.subr.bf16.mxu0 %v1390_v9 }
 0x268   :  { %674 = vmatpush1.bf16.msra.mxu0 %v1391_v11 }
 0x2fe   :  { %v585_v12 = vpop.f32.mrb[4].mxu0 }
 0x2ff   :  { %v592_v14 = vmul.f32 0.00390625, %v585_v12  ;;  %v587_v15 = vpop.f32.mrb[5].mxu0 }
 0x300   :  { %v593_v18 = vmul.f32 0.00390625, %v587_v15  ;;  %v589_v23 = vpop.f32.mrb[6].mxu0 }
 0x301   :  { %v594_v28 = vsub.f32 %v1275_v53, %v592_v14  ;;  %v590_v30 = vpop.f32.mrb[7].mxu0 }
 0x302   :  { %v595_v32 = vsub.f32 %v1277_v48, %v593_v18 }
 0x303   :  { %v596_v36 = vpack.c.bf16 %v594_v28, %v594_v28 }
 0x304   :  { %v597_v34 = vpack.c.bf16 %v595_v32, %v595_v32 }
 0x306   :  { %630 = vmatprep.mubr.bf16.mxu1 %v597_v34 }
 0x307   :  { %631 = vmatmul.mubr.bf16.vlgmr.msra.gmra.mrb[4].mxu1 %v596_v36 }
 0x3da   :  { %v632_v37 = vpop.f32.mrb[4].mxu1 }
 0x3db   :  { %v639_v38 = vsub.f32 %v632_v37, %v1200_v63  ;;  %v634_v39 = vpop.f32.mrb[5].mxu1 }
 0x3dc   :  { %v640_v40 = vsub.f32 %v634_v39, %v1095_v24  ;;  %v636_v41 = vpop.f32.mrb[6].mxu1 }
 0x3dd   :  { %v637_v42 = vpop.f32.mrb[7].mxu1  ;;  %v641_v44 = vpack.c.bf16 %v639_v38, %v639_v38 }
 0x3de   :  { %v642_v43 = vpack.c.bf16 %v640_v40, %v640_v40 }
 0x3e0   :  { %675 = vmatprep.mubr.bf16.mxu0 %v642_v43 }
 0x3e1   :  { %676 = vmatmul.mubr.bf16.vlgmr.msra.gmra.mrb[8].mxu0 %v641_v44 }
 0x4b4   :  { %v677_v45 = vpop.f32.mrb[8].mxu0 }
 0x4b5   :  { %v684_v46 = vmul.f32 0.00390625, %v677_v45  ;;  %v679_v47 = vpop.f32.mrb[9].mxu0 }
 0x4b6   :  { %v685_v48 = vmul.f32 0.00390625, %v679_v47  ;;  %v681_v49 = vpop.f32.mrb[10].mxu0 }
 0x4b7   :  { %v686_v50 = vsub.f32 %v594_v28, %v684_v46  ;;  %v682_v52 = vpop.f32.mrb[11].mxu0 }
 0x4b8   :  { %v687_v53 = vsub.f32 %v595_v32, %v685_v48 }
 0x4b9   :  { %688 = vst [vmem:[#allocation8] sm:$0xff] %v686_v50 }
 0x4ba   :  { %689 = vst [vmem:[#allocation8 + $0x8] sm:$0xff] %v687_v53 }
 0x4bb   :  { %949 = shalt.err (!%p946_p0)
}
 0x4bc   :  { %s950_s30 = scalar_lea.hbm %s1364_s4, 256 }
 0x4bd   :  { %p951_p1 = scmp.ne.s32.totalorder %s1364_s4, %s950_s30  ;;  %p954_p2 = scmp.lt.u32.totalorder %s950_s30, %s1364_s4 }
 0x4bf   :  { %p956_p3 = pnand %p954_p2, %p951_p1 }
 0x4c1   :  { %959 = shalt.err (!%p956_p3)
}
 0x4c2   :  { %699 = dma.vmem_to_hbm [thread:$0]  %s697_s26, 256, %s1364_s4, [#allocation4]  }
 0x4c3   :  { %964 = dma.done.wait [#allocation4], 256  }
 0x4c4   :  { %965 = vsyncadd [#allocation4], 4294967040 }
 0x4c5   :  { %703 = vsyncpa [#allocation3], 1 }
 0x4c6   :  { %704 = vsyncpa [#allocation6], 1 }
 0x4c7   :  { %705 = vsyncpa [#allocation4], 1 }

// kernel: tpu_custom_call.1
= control target key start
LH: loop header
LB: loop body
LE: loop exit
PB: predicated region body
PF: predicated region fallthrough
CT: control target
= control target key end

     0   :  { %9 = vsyncpa [#allocation3], 0  ;;  %s1360_s0 = inlined_call_operand.hbm [shape: f32[8,256], index: 0, kind: input, shape index: {}]   ;;  %s1361_s1 = inlined_call_operand.vmem [shape: f32[1,256], index: 1, kind: input, shape index: {}]   ;;  %s1362_s2 = inlined_call_operand.hbm [shape: bf16[256,256], index: 2, kind: input, shape index: {}]   ;;  %s1363_s3 = inlined_call_operand.hbm [shape: bf16[256,256], index: 3, kind: input, shape index: {}]   ;;  %s1364_s4 = inlined_call_operand.hbm [shape: f32[8,256], index: 4, kind: output, shape index: {}]  }
   0x1   :  { %10 = vsyncpa [#allocation6], 0 }
   0x2   :  { %11 = vsyncpa [#allocation4], 0  ;;  %s966_s15 = smov [#allocation5]   ;;  %s872_s19 = scalar_lea.hbm %s1362_s2, 4096 }
   0x3   :  { %s29_s16 = sshll.u32 %s966_s15, 4  ;;  %p873_p0 = scmp.ne.s32.totalorder %s1362_s2, %s872_s19  ;;  %s30_s16 = int_to_ptr.vmem [resolvable:$true] %s29_s16 }
   0x4   :  { %p876_p1 = scmp.lt.u32.totalorder %s872_s19, %s1362_s2 }
   0x6   :  { %p878_p2 = pnand %p876_p1, %p873_p0 }
   0x8   :  { %881 = shalt.err (!%p878_p2)
}
   0x9   :  { %s882_s24 = scalar_lea.vmem %s30_s16, 4096  ;;  %p887_p4 = scmp.lt.s32.totalorder %s30_s16, %s30_s16 }
   0xa   :  { %p883_p3 = scmp.ne.s32.totalorder %s30_s16, %s882_s24  ;;  %p888_p5 = scmp.lt.s32.totalorder %s882_s24, %s882_s24 }
   0xc   :  { %p889_p6 = por %p888_p5, %p887_p4 }
   0xe   :  { %p890_p7 = pnand %p889_p6, %p883_p3 }
  0x10   :  { %893 = shalt.err (!%p890_p7)
}
  0x11   :  { %s967_s25 = smov 128   ;;  %s968_s26 = smov 8  }
  0x12   :  { %35 = dma.hbm_to_vmem [thread:$0]  %s1362_s2, 4096, %s30_s16, [#allocation6], %s967_s25, %s967_s25, %s968_s26  }
  0x13   :  { %s969_s29 = smov [#allocation2]   ;;  %s970_s5 = smov [#allocation7]  }
  0x14   :  { %s18_s30 = sshll.u32 %s969_s29, 4  ;;  %s41_s6 = sshll.u32 %s970_s5, 4  ;;  %s19_s30 = int_to_ptr.vmem [resolvable:$true] %s18_s30  ;;  %s42_s6 = int_to_ptr.vmem [resolvable:$true] %s41_s6 }
  0x15   :  { %s894_s9 = scalar_lea.hbm %s1360_s0, 256 }
  0x16   :  { %p895_p8 = scmp.ne.s32.totalorder %s1360_s0, %s894_s9  ;;  %p898_p9 = scmp.lt.u32.totalorder %s894_s9, %s1360_s0 }
  0x18   :  { %p900_p10 = pnand %p898_p9, %p895_p8 }
  0x1a   :  { %903 = shalt.err (!%p900_p10)
}
  0x1b   :  { %s904_s2 = scalar_lea.vmem %s19_s30, 256  ;;  %p909_p12 = scmp.lt.s32.totalorder %s19_s30, %s19_s30 }
  0x1c   :  { %p905_p11 = scmp.ne.s32.totalorder %s19_s30, %s904_s2  ;;  %p910_p13 = scmp.lt.s32.totalorder %s904_s2, %s904_s2 }
  0x1e   :  { %p911_p0 = por %p910_p13, %p909_p12 }
  0x20   :  { %p912_p1 = pnand %p911_p0, %p905_p11 }
  0x22   :  { %915 = shalt.err (!%p912_p1)
}
  0x23   :  { %21 = dma.hbm_to_vmem [thread:$0]  %s1360_s0, 256, %s19_s30, [#allocation3]  }
  0x24   :  { %s916_s18 = scalar_lea.hbm %s1363_s3, 4096 }
  0x25   :  { %p917_p2 = scmp.ne.s32.totalorder %s1363_s3, %s916_s18  ;;  %p920_p3 = scmp.lt.u32.totalorder %s916_s18, %s1363_s3 }
  0x27   :  { %p922_p4 = pnand %p920_p3, %p917_p2 }
  0x29   :  { %925 = shalt.err (!%p922_p4)
}
  0x2a   :  { %s926_s23 = scalar_lea.vmem %s42_s6, 4096  ;;  %p931_p6 = scmp.lt.s32.totalorder %s42_s6, %s42_s6 }
  0x2b   :  { %p927_p5 = scmp.ne.s32.totalorder %s42_s6, %s926_s23  ;;  %p932_p7 = scmp.lt.s32.totalorder %s926_s23, %s926_s23 }
  0x2d   :  { %p933_p8 = por %p932_p7, %p931_p6 }
  0x2f   :  { %p934_p9 = pnand %p933_p8, %p927_p5 }
  0x31   :  { %937 = shalt.err (!%p934_p9)
}
  0x32   :  { %47 = dma.hbm_to_vmem [thread:$0]  %s1363_s3, 4096, %s42_s6, [#allocation6], %s967_s25, %s967_s25, %s968_s26  }
  0x33   :  { %960 = dma.done.wait [#allocation3], 256  }
  0x34   :  { %961 = vsyncadd [#allocation3], 4294967040 }
  0x35   :  { %962 = dma.done.wait [#allocation6], 8192  }
  0x36   :  { %963 = vsyncadd [#allocation6], 4294959104  ;;  %v1039_v0 = vld [vmem:[#allocation7 + $0x4] ss:$8 sps:$4 sm:$0xff]   ;;  %v1041_v1 = vld [vmem:[#allocation7] ss:$8 sps:$4 sm:$0xff]   ;;  %v63_v7 = vlaneseq }
  0x37   :  { %269 = vmatprep.subr.bf16.mxu0 %v1039_v0  ;;  %v1044_v2 = vld [vmem:[#allocation7 + $0x14] ss:$8 sps:$4 sm:$0xff]   ;;  %v1047_v3 = vld [vmem:[#allocation7 + $0x10] ss:$8 sps:$4 sm:$0xff]   ;;  %v1050_v4 = vld [vmem:[#allocation7 + $0x24] ss:$8 sps:$4 sm:$0xff]  }
  0x38   :  { %270 = vmatpush1.bf16.msra.mxu0 %v1041_v1  ;;  %v1053_v5 = vld [vmem:[#allocation7 + $0x20] ss:$8 sps:$4 sm:$0xff]   ;;  %v1056_v6 = vld [vmem:[#allocation7 + $0x34] ss:$8 sps:$4 sm:$0xff]   ;;  %v1059_v8 = vld [vmem:[#allocation7 + $0x30] ss:$8 sps:$4 sm:$0xff]  }
  0x39   :  { %271 = vmatprep.subr.bf16.mxu0 %v1044_v2  ;;  %v1062_v9 = vld [vmem:[#allocation7 + $0x44] ss:$8 sps:$4 sm:$0xff]   ;;  %v1064_v10 = vshrl.u32 %v63_v7, 7  ;;  %v1067_v11 = vld [vmem:[#allocation7 + $0x40] ss:$8 sps:$4 sm:$0xff]   ;;  %v58_v16 = vld [vmem:[#allocation2 + $0x8] sm:$0xff] }
  0x3a   :  { %v1070_v12 = vld [vmem:[#allocation7 + $0x54] ss:$8 sps:$4 sm:$0xff]   ;;  %v1074_v14 = vld [vmem:[#allocation7 + $0x50] ss:$8 sps:$4 sm:$0xff]   ;;  %v1077_v15 = vld [vmem:[#allocation7 + $0x64] ss:$8 sps:$4 sm:$0xff]  }
  0x3b   :  { %v69_v13 = vsub.s32 1, %v1064_v10  ;;  %v1082_v17 = vld [vmem:[%s1361_s1] sm:$0x3]  ;;  %v1084_v18 = vld [vmem:[#allocation7 + $0x60] ss:$8 sps:$4 sm:$0xff]   ;;  %v60_v19 = vmul.f32 2.0, %v58_v16 }
  0x3c   :  { %272 = vmatpush1.bf16.msra.mxu0 %v1047_v3  ;;  %v1088_v21 = vld [vmem:[#allocation5 + $0x4] ss:$8 sps:$4 sm:$0xff]   ;;  %v1090_v22 = vld [vmem:[#allocation5] ss:$8 sps:$4 sm:$0xff]   ;;  %v1093_v23 = vld [vmem:[#allocation7 + $0x74] ss:$8 sps:$4 sm:$0xff]  }
  0x3d   :  { %273 = vmatprep.subr.bf16.mxu0 %v1050_v4  ;;  %v70_v20 = vrot.slane %v1082_v17, %v69_v13  ;;  %v1097_v25 = vld [vmem:[#allocation5 + $0x14] ss:$8 sps:$4 sm:$0xff]   ;;  %506 = vmatprep.subr.bf16.mxu1 %v1088_v21  ;;  %v1103_v27 = vld [vmem:[#allocation5 + $0x10] ss:$8 sps:$4 sm:$0xff]   ;;  %v1109_v29 = vld [vmem:[#allocation5 + $0x24] ss:$8 sps:$4 sm:$0xff]  }
  0x3e   :  { %507 = vmatpush1.bf16.msra.mxu1 %v1090_v22  ;;  %v1106_v28 = vld [vmem:[#allocation7 + $0x70] ss:$8 sps:$4 sm:$0xff]   ;;  %v1112_v30 = vld [vmem:[#allocation7 + $0x84] ss:$8 sps:$4 sm:$0xff]   ;;  %v1115_v31 = vld [vmem:[#allocation5 + $0x20] ss:$8 sps:$4 sm:$0xff]  }
  0x3f   :  { %v1095_v24 = vsub.f32 %v60_v19, %v70_v20  ;;  %508 = vmatprep.subr.bf16.mxu1 %v1097_v25  ;;  %v1118_v32 = vld [vmem:[#allocation7 + $0x80] ss:$8 sps:$4 sm:$0xff]   ;;  %v1121_v33 = vld [vmem:[#allocation5 + $0x34] ss:$8 sps:$4 sm:$0xff]   ;;  %v1127_v35 = vld [vmem:[#allocation5 + $0x30] ss:$8 sps:$4 sm:$0xff]  }
  0x40   :  { %274 = vmatpush1.bf16.msra.mxu0 %v1053_v5  ;;  %v1124_v34 = vld [vmem:[#allocation7 + $0x94] ss:$8 sps:$4 sm:$0xff]   ;;  %v1130_v36 = vld [vmem:[#allocation7 + $0x90] ss:$8 sps:$4 sm:$0xff]   ;;  %v1133_v37 = vld [vmem:[#allocation5 + $0x44] ss:$8 sps:$4 sm:$0xff]  }
  0x41   :  { %275 = vmatprep.subr.bf16.mxu0 %v1056_v6  ;;  %v76_v26 = vpack.c.bf16 %v1095_v24, %v1095_v24  ;;  %v1136_v38 = vld [vmem:[#allocation7 + $0xa4] ss:$8 sps:$4 sm:$0xff]   ;;  %v1139_v39 = vld [vmem:[#allocation5 + $0x40] ss:$8 sps:$4 sm:$0xff]   ;;  %v1145_v41 = vld [vmem:[#allocation5 + $0x54] ss:$8 sps:$4 sm:$0xff]  }
  0x42   :  { %509 = vmatpush1.bf16.msra.mxu1 %v1103_v27  ;;  %v1142_v40 = vld [vmem:[#allocation7 + $0xa0] ss:$8 sps:$4 sm:$0xff]   ;;  %v1148_v42 = vld [vmem:[#allocation7 + $0xb4] ss:$8 sps:$4 sm:$0xff]   ;;  %v1151_v43 = vld [vmem:[#allocation5 + $0x50] ss:$8 sps:$4 sm:$0xff]  }
  0x43   :  { %301 = vmatprep.mubr.bf16.mxu0 %v76_v26  ;;  %510 = vmatprep.subr.bf16.mxu1 %v1109_v29  ;;  %v1154_v44 = vld [vmem:[#allocation7 + $0xb0] ss:$8 sps:$4 sm:$0xff]   ;;  %v1157_v45 = vld [vmem:[#allocation5 + $0x64] ss:$8 sps:$4 sm:$0xff]   ;;  %v1163_v47 = vld [vmem:[#allocation5 + $0x60] ss:$8 sps:$4 sm:$0xff]  }
  0x44   :  { %276 = vmatpush1.bf16.msra.mxu0 %v1059_v8  ;;  %1374 = vst [vmem:[#allocation12_spill] sm:$0xff] %v1154_v44  ;;  %v1160_v46 = vld [vmem:[#allocation7 + $0xc4] ss:$8 sps:$4 sm:$0xff]   ;;  %v1166_v48 = vld [vmem:[#allocation7 + $0xc0] ss:$8 sps:$4 sm:$0xff]   ;;  %v65_v51 = vsub.s32 0, %v1064_v10 }
  0x45   :  { %277 = vmatprep.subr.bf16.mxu0 %v1062_v9  ;;  %1375 = vst [vmem:[#allocation13_spill] sm:$0xff] %v1160_v46  ;;  %1376 = vst [vmem:[#allocation14_spill] sm:$0xff] %v1166_v48  ;;  %v1169_v49 = vld [vmem:[#allocation5 + $0x74] ss:$8 sps:$4 sm:$0xff]   ;;  %v1176_v52 = vld [vmem:[#allocation5 + $0x70] ss:$8 sps:$4 sm:$0xff]  }
  0x46   :  { %511 = vmatpush1.bf16.msra.mxu1 %v1115_v31  ;;  %v1172_v50 = vld [vmem:[#allocation7 + $0xd4] ss:$8 sps:$4 sm:$0xff]   ;;  %v1179_v53 = vld [vmem:[#allocation7 + $0xd0] ss:$8 sps:$4 sm:$0xff]   ;;  %v1182_v55 = vld [vmem:[#allocation5 + $0x84] ss:$8 sps:$4 sm:$0xff]   ;;  %v66_v57 = vrot.slane %v1082_v17, %v65_v51 }
  0x47   :  { %512 = vmatprep.subr.bf16.mxu1 %v1121_v33  ;;  %1377 = vst [vmem:[#allocation15_spill] sm:$0xff] %v1172_v50  ;;  %1378 = vst [vmem:[#allocation16_spill] sm:$0xff] %v1179_v53  ;;  %v57_v54 = vld [vmem:[#allocation2] sm:$0xff]  ;;  %v1185_v56 = vld [vmem:[#allocation7 + $0xe4] ss:$8 sps:$4 sm:$0xff]   ;;  %s971_s1 = smov [#allocation8]  }
  0x48   :  { %278 = vmatpush1.bf16.msra.mxu0 %v1067_v11  ;;  %1379 = vst [vmem:[#allocation17_spill] sm:$0xff] %v1185_v56  ;;  %v59_v58 = vmul.f32 2.0, %v57_v54  ;;  %v1189_v59 = vld [vmem:[#allocation5 + $0x80] ss:$8 sps:$4 sm:$0xff]   ;;  %v1195_v61 = vld [vmem:[#allocation5 + $0x94] ss:$8 sps:$4 sm:$0xff]  }
  0x49   :  { %279 = vmatprep.subr.bf16.mxu0 %v1070_v12  ;;  %v1192_v60 = vld [vmem:[#allocation7 + $0xe0] ss:$8 sps:$4 sm:$0xff]   ;;  %v1198_v62 = vld [vmem:[#allocation7 + $0xf4] ss:$8 sps:$4 sm:$0xff]   ;;  %v1203_v7 = vld [vmem:[#allocation5 + $0x90] ss:$8 sps:$4 sm:$0xff]  }
  0x4a   :  { %513 = vmatpush1.bf16.msra.mxu1 %v1127_v35  ;;  %1380 = vst [vmem:[#allocation18_spill] sm:$0xff] %v1192_v60  ;;  %1381 = vst [vmem:[#allocation19_spill] sm:$0xff] %v1198_v62  ;;  %v1200_v63 = vsub.f32 %v59_v58, %v66_v57  ;;  %v1206_v10 = vld [vmem:[#allocation7 + $0xf0] ss:$8 sps:$4 sm:$0xff]   ;;  %v1209_v13 = vld [vmem:[#allocation5 + $0xa4] ss:$8 sps:$4 sm:$0xff]  }
  0x4b   :  { %514 = vmatprep.subr.bf16.mxu1 %v1133_v37  ;;  %1382 = vst [vmem:[#allocation20_spill] sm:$0xff] %v1206_v10  ;;  %v1215_v17 = vld [vmem:[#allocation5 + $0xa0] ss:$8 sps:$4 sm:$0xff]   ;;  %v1219_v19 = vld [vmem:[#allocation5 + $0xb4] ss:$8 sps:$4 sm:$0xff]   ;;  %s696_s26 = sshll.u32 %s971_s1, 4  ;;  %s697_s26 = int_to_ptr.vmem [resolvable:$true] %s696_s26 }
  0x4c   :  { %280 = vmatpush1.bf16.msra.mxu0 %v1074_v14  ;;  %v75_v16 = vpack.c.bf16 %v1200_v63, %v1200_v63  ;;  %v1223_v20 = vld [vmem:[#allocation5 + $0xb0] ss:$8 sps:$4 sm:$0xff]   ;;  %v1226_v26 = vld [vmem:[#allocation5 + $0xc4] ss:$8 sps:$4 sm:$0xff]   ;;  %v1231_v51 = vld [vmem:[#allocation5 + $0xc0] ss:$8 sps:$4 sm:$0xff]   ;;  %p943_p11 = scmp.lt.s32.totalorder %s697_s26, %s697_s26 }
  0x4d   :  { %281 = vmatprep.subr.bf16.mxu0 %v1077_v15  ;;  %v1234_v54 = vld [vmem:[#allocation5 + $0xd4] ss:$8 sps:$4 sm:$0xff]   ;;  %v1239_v57 = vld [vmem:[#allocation5 + $0xd0] ss:$8 sps:$4 sm:$0xff]   ;;  %v1242_v58 = vld [vmem:[#allocation5 + $0xe4] ss:$8 sps:$4 sm:$0xff]  }
  0x4e   :  { %515 = vmatpush1.bf16.msra.mxu1 %v1139_v39  ;;  %s938_s27 = scalar_lea.vmem %s697_s26, 256 }
  0x4f   :  { %516 = vmatprep.subr.bf16.mxu1 %v1145_v41  ;;  %p939_p10 = scmp.ne.s32.totalorder %s697_s26, %s938_s27  ;;  %p944_p12 = scmp.lt.s32.totalorder %s938_s27, %s938_s27 }
  0x50   :  { %282 = vmatpush1.bf16.msra.mxu0 %v1084_v18 }
  0x51   :  { %283 = vmatprep.subr.bf16.mxu0 %v1093_v23  ;;  %p945_p13 = por %p944_p12, %p943_p11 }
  0x52   :  { %517 = vmatpush1.bf16.msra.mxu1 %v1151_v43 }
  0x53   :  { %518 = vmatprep.subr.bf16.mxu1 %v1157_v45  ;;  %p946_p0 = pnand %p945_p13, %p939_p10 }
  0x54   :  { %284 = vmatpush1.bf16.msra.mxu0 %v1106_v28 }
  0x55   :  { %285 = vmatprep.subr.bf16.mxu0 %v1112_v30 }
  0x56   :  { %519 = vmatpush1.bf16.msra.mxu1 %v1163_v47 }
  0x57   :  { %520 = vmatprep.subr.bf16.mxu1 %v1169_v49 }
  0x58   :  { %286 = vmatpush1.bf16.msra.mxu0 %v1118_v32 }
  0x59   :  { %287 = vmatprep.subr.bf16.mxu0 %v1124_v34 }
  0x5a   :  { %521 = vmatpush1.bf16.msra.mxu1 %v1176_v52 }
  0x5b   :  { %522 = vmatprep.subr.bf16.mxu1 %v1182_v55 }
  0x5c   :  { %288 = vmatpush1.bf16.msra.mxu0 %v1130_v36 }
  0x5d   :  { %289 = vmatprep.subr.bf16.mxu0 %v1136_v38 }
  0x5e   :  { %523 = vmatpush1.bf16.msra.mxu1 %v1189_v59 }
  0x5f   :  { %524 = vmatprep.subr.bf16.mxu1 %v1195_v61 }
  0x60   :  { %290 = vmatpush1.bf16.msra.mxu0 %v1142_v40 }
  0x61   :  { %291 = vmatprep.subr.bf16.mxu0 %v1148_v42 }
  0x62   :  { %525 = vmatpush1.bf16.msra.mxu1 %v1203_v7 }
  0x63   :  { %526 = vmatprep.subr.bf16.mxu1 %v1209_v13 }
  0x64   :  { %292 = vmatpush1.bf16.msra.mxu0 %v1154_v44 }
  0x65   :  { %293 = vmatprep.subr.bf16.mxu0 %v1160_v46 }
  0x66   :  { %527 = vmatpush1.bf16.msra.mxu1 %v1215_v17 }
  0x67   :  { %528 = vmatprep.subr.bf16.mxu1 %v1219_v19 }
  0x68   :  { %294 = vmatpush1.bf16.msra.mxu0 %v1166_v48 }
  0x69   :  { %295 = vmatprep.subr.bf16.mxu0 %v1172_v50 }
  0x6a   :  { %529 = vmatpush1.bf16.msra.mxu1 %v1223_v20 }
  0x6b   :  { %530 = vmatprep.subr.bf16.mxu1 %v1226_v26 }
  0x6c   :  { %296 = vmatpush1.bf16.msra.mxu0 %v1179_v53 }
  0x6d   :  { %297 = vmatprep.subr.bf16.mxu0 %v1185_v56 }
  0x6e   :  { %531 = vmatpush1.bf16.msra.mxu1 %v1231_v51 }
  0x6f   :  { %532 = vmatprep.subr.bf16.mxu1 %v1234_v54 }
  0x70   :  { %298 = vmatpush1.bf16.msra.mxu0 %v1192_v60 }
  0x71   :  { %299 = vmatprep.subr.bf16.mxu0 %v1198_v62 }
  0x72   :  { %533 = vmatpush1.bf16.msra.mxu1 %v1239_v57 }
  0x73   :  { %534 = vmatprep.subr.bf16.mxu1 %v1242_v58 }
  0x74   :  { %300 = vmatpush1.bf16.msra.mxu0 %v1206_v10 }
  0x75   :  { %551 = vmatprep.subr.bf16.mxu0 %v1039_v0 }
  0x77   :  { %302 = vmatmul.mubr.bf16.vlgmr.msra.gmra.mrb[0].mxu0 %v75_v16  ;;  %v868_v16 = vld [vmem:[#allocation5 + $0xe0] ss:$8 sps:$4 sm:$0xff]  }
  0x78   :  { %552 = vmatpush1.bf16.msra.mxu0 %v1041_v1  ;;  %535 = vmatpush1.bf16.msra.mxu1 %v868_v16 }
  0x79   :  { %553 = vmatprep.subr.bf16.mxu0 %v1044_v2 }
  0x7c   :  { %554 = vmatpush1.bf16.msra.mxu0 %v1047_v3 }
  0x7d   :  { %555 = vmatprep.subr.bf16.mxu0 %v1050_v4 }
  0x80   :  { %556 = vmatpush1.bf16.msra.mxu0 %v1053_v5 }
  0x81   :  { %557 = vmatprep.subr.bf16.mxu0 %v1056_v6 }
  0x84   :  { %558 = vmatpush1.bf16.msra.mxu0 %v1059_v8 }
  0x85   :  { %559 = vmatprep.subr.bf16.mxu0 %v1062_v9 }
  0x88   :  { %560 = vmatpush1.bf16.msra.mxu0 %v1067_v11 }
  0x89   :  { %561 = vmatprep.subr.bf16.mxu0 %v1070_v12 }
  0x8c   :  { %562 = vmatpush1.bf16.msra.mxu0 %v1074_v14 }
  0x8d   :  { %563 = vmatprep.subr.bf16.mxu0 %v1077_v15 }
  0x90   :  { %564 = vmatpush1.bf16.msra.mxu0 %v1084_v18 }
  0x91   :  { %565 = vmatprep.subr.bf16.mxu0 %v1093_v23 }
  0x94   :  { %566 = vmatpush1.bf16.msra.mxu0 %v1106_v28 }
  0x95   :  { %567 = vmatprep.subr.bf16.mxu0 %v1112_v30 }
  0x98   :  { %568 = vmatpush1.bf16.msra.mxu0 %v1118_v32 }
  0x99   :  { %569 = vmatprep.subr.bf16.mxu0 %v1124_v34 }
  0x9c   :  { %570 = vmatpush1.bf16.msra.mxu0 %v1130_v36 }
  0x9d   :  { %571 = vmatprep.subr.bf16.mxu0 %v1136_v38 }
  0xa0   :  { %572 = vmatpush1.bf16.msra.mxu0 %v1142_v40 }
  0xa1   :  { %573 = vmatprep.subr.bf16.mxu0 %v1148_v42 }
  0xa4   :  { %574 = vmatpush1.bf16.msra.mxu0 %v1154_v44  ;;  %v869_v44 = vld [vmem:[#allocation5 + $0xf4] ss:$8 sps:$4 sm:$0xff]  }
  0xa5   :  { %575 = vmatprep.subr.bf16.mxu0 %v1160_v46  ;;  %v871_v46 = vld [vmem:[#allocation5 + $0xf0] ss:$8 sps:$4 sm:$0xff]   ;;  %536 = vmatprep.subr.bf16.mxu1 %v869_v44 }
  0xa6   :  { %537 = vmatpush1.bf16.msra.mxu1 %v871_v46 }
  0xa7   :  { %598 = vmatprep.subr.bf16.mxu1 %v1088_v21 }
  0xa8   :  { %576 = vmatpush1.bf16.msra.mxu0 %v1166_v48 }
  0xa9   :  { %577 = vmatprep.subr.bf16.mxu0 %v1172_v50 }
  0xac   :  { %578 = vmatpush1.bf16.msra.mxu0 %v1179_v53 }
  0xad   :  { %579 = vmatprep.subr.bf16.mxu0 %v1185_v56 }
  0xb0   :  { %580 = vmatpush1.bf16.msra.mxu0 %v1192_v60 }
  0xb1   :  { %581 = vmatprep.subr.bf16.mxu0 %v1198_v62 }
  0xb4   :  { %582 = vmatpush1.bf16.msra.mxu0 %v1206_v10 }
  0xb5   :  { %643 = vmatprep.subr.bf16.mxu0 %v1039_v0 }
 0x14a   :  { %v303_v50 = vpop.f32.mrb[0].mxu0 }
 0x14b   :  { %v1275_v53 = vmul.f32 0.00390625, %v303_v50  ;;  %v305_v56 = vpop.f32.mrb[1].mxu0 }
 0x14c   :  { %v1277_v48 = vmul.f32 0.00390625, %v305_v56  ;;  %v307_v60 = vpop.f32.mrb[2].mxu0 }
 0x14d   :  { %v308_v62 = vpop.f32.mrb[3].mxu0  ;;  %v312_v0 = vpack.c.bf16 %v1275_v53, %v1275_v53 }
 0x14e   :  { %v313_v10 = vpack.c.bf16 %v1277_v48, %v1277_v48 }
 0x150   :  { %538 = vmatprep.mubr.bf16.mxu1 %v313_v10 }
 0x151   :  { %539 = vmatmul.mubr.bf16.vlgmr.msra.gmra.mrb[0].mxu1 %v312_v0 }
 0x152   :  { %599 = vmatpush1.bf16.msra.mxu1 %v1090_v22 }
 0x153   :  { %600 = vmatprep.subr.bf16.mxu1 %v1097_v25 }
 0x156   :  { %601 = vmatpush1.bf16.msra.mxu1 %v1103_v27 }
 0x157   :  { %602 = vmatprep.subr.bf16.mxu1 %v1109_v29 }
 0x15a   :  { %603 = vmatpush1.bf16.msra.mxu1 %v1115_v31 }
 0x15b   :  { %604 = vmatprep.subr.bf16.mxu1 %v1121_v33 }
 0x15e   :  { %605 = vmatpush1.bf16.msra.mxu1 %v1127_v35 }
 0x15f   :  { %606 = vmatprep.subr.bf16.mxu1 %v1133_v37 }
 0x162   :  { %607 = vmatpush1.bf16.msra.mxu1 %v1139_v39 }
 0x163   :  { %608 = vmatprep.subr.bf16.mxu1 %v1145_v41 }
 0x166   :  { %609 = vmatpush1.bf16.msra.mxu1 %v1151_v43 }
 0x167   :  { %610 = vmatprep.subr.bf16.mxu1 %v1157_v45 }
 0x16a   :  { %611 = vmatpush1.bf16.msra.mxu1 %v1163_v47 }
 0x16b   :  { %612 = vmatprep.subr.bf16.mxu1 %v1169_v49 }
 0x16e   :  { %613 = vmatpush1.bf16.msra.mxu1 %v1176_v52 }
 0x16f   :  { %614 = vmatprep.subr.bf16.mxu1 %v1182_v55 }
 0x172   :  { %615 = vmatpush1.bf16.msra.mxu1 %v1189_v59 }
 0x173   :  { %616 = vmatprep.subr.bf16.mxu1 %v1195_v61 }
 0x176   :  { %617 = vmatpush1.bf16.msra.mxu1 %v1203_v7 }
 0x177   :  { %618 = vmatprep.subr.bf16.mxu1 %v1209_v13 }
 0x17a   :  { %619 = vmatpush1.bf16.msra.mxu1 %v1215_v17 }
 0x17b   :  { %620 = vmatprep.subr.bf16.mxu1 %v1219_v19 }
 0x17e   :  { %621 = vmatpush1.bf16.msra.mxu1 %v1223_v20 }
 0x17f   :  { %622 = vmatprep.subr.bf16.mxu1 %v1226_v26 }
 0x182   :  { %623 = vmatpush1.bf16.msra.mxu1 %v1231_v51 }
 0x183   :  { %624 = vmatprep.subr.bf16.mxu1 %v1234_v54 }
 0x186   :  { %625 = vmatpush1.bf16.msra.mxu1 %v1239_v57 }
 0x187   :  { %626 = vmatprep.subr.bf16.mxu1 %v1242_v58 }
 0x18a   :  { %627 = vmatpush1.bf16.msra.mxu1 %v868_v16 }
 0x18b   :  { %628 = vmatprep.subr.bf16.mxu1 %v869_v44 }
 0x18e   :  { %629 = vmatpush1.bf16.msra.mxu1 %v871_v46 }
 0x224   :  { %v540_v21 = vpop.f32.mrb[0].mxu1 }
 0x225   :  { %v547_v22 = vsub.f32 %v540_v21, %v1200_v63  ;;  %v542_v25 = vpop.f32.mrb[1].mxu1 }
 0x226   :  { %v548_v27 = vsub.f32 %v542_v25, %v1095_v24  ;;  %v544_v29 = vpop.f32.mrb[2].mxu1 }
 0x227   :  { %v545_v31 = vpop.f32.mrb[3].mxu1  ;;  %v549_v35 = vpack.c.bf16 %v547_v22, %v547_v22 }
 0x228   :  { %v550_v33 = vpack.c.bf16 %v548_v27, %v548_v27 }
 0x22a   :  { %583 = vmatprep.mubr.bf16.mxu0 %v550_v33 }
 0x22b   :  { %584 = vmatmul.mubr.bf16.vlgmr.msra.gmra.mrb[4].mxu0 %v549_v35 }
 0x22c   :  { %644 = vmatpush1.bf16.msra.mxu0 %v1041_v1  ;;  %v1383_v1 = vld [vmem:[#allocation12_spill] sm:$0xff] }
 0x22d   :  { %645 = vmatprep.subr.bf16.mxu0 %v1044_v2  ;;  %v1384_v2 = vld [vmem:[#allocation13_spill] sm:$0xff] }
 0x230   :  { %646 = vmatpush1.bf16.msra.mxu0 %v1047_v3  ;;  %v1385_v3 = vld [vmem:[#allocation14_spill] sm:$0xff] }
 0x231   :  { %647 = vmatprep.subr.bf16.mxu0 %v1050_v4  ;;  %v1386_v4 = vld [vmem:[#allocation15_spill] sm:$0xff] }
 0x234   :  { %648 = vmatpush1.bf16.msra.mxu0 %v1053_v5  ;;  %v1387_v5 = vld [vmem:[#allocation16_spill] sm:$0xff] }
 0x235   :  { %649 = vmatprep.subr.bf16.mxu0 %v1056_v6  ;;  %v1388_v6 = vld [vmem:[#allocation17_spill] sm:$0xff] }
 0x238   :  { %650 = vmatpush1.bf16.msra.mxu0 %v1059_v8  ;;  %v1389_v8 = vld [vmem:[#allocation18_spill] sm:$0xff] }
 0x239   :  { %651 = vmatprep.subr.bf16.mxu0 %v1062_v9  ;;  %v1390_v9 = vld [vmem:[#allocation19_spill] sm:$0xff] }
 0x23c   :  { %652 = vmatpush1.bf16.msra.mxu0 %v1067_v11  ;;  %v1391_v11 = vld [vmem:[#allocation20_spill] sm:$0xff] }
 0x23d   :  { %653 = vmatprep.subr.bf16.mxu0 %v1070_v12 }
 0x240   :  { %654 = vmatpush1.bf16.msra.mxu0 %v1074_v14 }
 0x241   :  { %655 = vmatprep.subr.bf16.mxu0 %v1077_v15 }
 0x244   :  { %656 = vmatpush1.bf16.msra.mxu0 %v1084_v18 }
 0x245   :  { %657 = vmatprep.subr.bf16.mxu0 %v1093_v23 }
 0x248   :  { %658 = vmatpush1.bf16.msra.mxu0 %v1106_v28 }
 0x249   :  { %659 = vmatprep.subr.bf16.mxu0 %v1112_v30 }
 0x24c   :  { %660 = vmatpush1.bf16.msra.mxu0 %v1118_v32 }
 0x24d   :  { %661 = vmatprep.subr.bf16.mxu0 %v1124_v34 }
 0x250   :  { %662 = vmatpush1.bf16.msra.mxu0 %v1130_v36 }
 0x251   :  { %663 = vmatprep.subr.bf16.mxu0 %v1136_v38 }
 0x254   :  { %664 = vmatpush1.bf16.msra.mxu0 %v1142_v40 }
 0x255   :  { %665 = vmatprep.subr.bf16.mxu0 %v1148_v42 }
 0x258   :  { %666 = vmatpush1.bf16.msra.mxu0 %v1383_v1 }
 0x259   :  { %667 = vmatprep.subr.bf16.mxu0 %v1384_v2 }
 0x25c   :  { %668 = vmatpush1.bf16.msra.mxu0 %v1385_v3 }
 0x25d   :  { %669 = vmatprep.subr.bf16.mxu0 %v1386_v4 }
 0x260   :  { %670 = vmatpush1.bf16.msra.mxu0 %v1387_v5 }
 0x261   :  { %671 = vmatprep.subr.bf16.mxu0 %v1388_v6 }
 0x264   :  { %672 = vmatpush1.bf16.msra.mxu0 %v1389_v8 }
 0x265   :  { %673 = vmatprep.subr.bf16.mxu0 %v1390_v9 }
 0x268   :  { %674 = vmatpush1.bf16.msra.mxu0 %v1391_v11 }
 0x2fe   :  { %v585_v12 = vpop.f32.mrb[4].mxu0 }
 0x2ff   :  { %v592_v14 = vmul.f32 0.00390625, %v585_v12  ;;  %v587_v15 = vpop.f32.mrb[5].mxu0 }
 0x300   :  { %v593_v18 = vmul.f32 0.00390625, %v587_v15  ;;  %v589_v23 = vpop.f32.mrb[6].mxu0 }
 0x301   :  { %v594_v28 = vsub.f32 %v1275_v53, %v592_v14  ;;  %v590_v30 = vpop.f32.mrb[7].mxu0 }
 0x302   :  { %v595_v32 = vsub.f32 %v1277_v48, %v593_v18 }
 0x303   :  { %v596_v36 = vpack.c.bf16 %v594_v28, %v594_v28 }
 0x304   :  { %v597_v34 = vpack.c.bf16 %v595_v32, %v595_v32 }
 0x306   :  { %630 = vmatprep.mubr.bf16.mxu1 %v597_v34 }
 0x307   :  { %631 = vmatmul.mubr.bf16.vlgmr.msra.gmra.mrb[4].mxu1 %v596_v36 }
 0x3da   :  { %v632_v37 = vpop.f32.mrb[4].mxu1 }
 0x3db   :  { %v639_v38 = vsub.f32 %v632_v37, %v1200_v63  ;;  %v634_v39 = vpop.f32.mrb[5].mxu1 }
 0x3dc   :  { %v640_v40 = vsub.f32 %v634_v39, %v1095_v24  ;;  %v636_v41 = vpop.f32.mrb[6].mxu1 }
 0x3dd   :  { %v637_v42 = vpop.f32.mrb[7].mxu1  ;;  %v641_v44 = vpack.c.bf16 %v639_v38, %v639_v38 }
 0x3de   :  { %v642_v43 = vpack.c.bf16 %v640_v40, %v640_v40 }
 0x3e0   :  { %675 = vmatprep.mubr.bf16.mxu0 %v642_v43 }
 0x3e1   :  { %676 = vmatmul.mubr.bf16.vlgmr.msra.gmra.mrb[8].mxu0 %v641_v44 }
 0x4b4   :  { %v677_v45 = vpop.f32.mrb[8].mxu0 }
 0x4b5   :  { %v684_v46 = vmul.f32 0.00390625, %v677_v45  ;;  %v679_v47 = vpop.f32.mrb[9].mxu0 }
 0x4b6   :  { %v685_v48 = vmul.f32 0.00390625, %v679_v47  ;;  %v681_v49 = vpop.f32.mrb[10].mxu0 }
 0x4b7   :  { %v686_v50 = vsub.f32 %v594_v28, %v684_v46  ;;  %v682_v52 = vpop.f32.mrb[11].mxu0 }
 0x4b8   :  { %v687_v53 = vsub.f32 %v595_v32, %v685_v48 }
 0x4b9   :  { %688 = vst [vmem:[#allocation8] sm:$0xff] %v686_v50 }
 0x4ba   :  { %689 = vst [vmem:[#allocation8 + $0x8] sm:$0xff] %v687_v53 }
 0x4bb   :  { %949 = shalt.err (!%p946_p0)
}
 0x4bc   :  { %s950_s30 = scalar_lea.hbm %s1364_s4, 256 }
 0x4bd   :  { %p951_p1 = scmp.ne.s32.totalorder %s1364_s4, %s950_s30  ;;  %p954_p2 = scmp.lt.u32.totalorder %s950_s30, %s1364_s4 }
 0x4bf   :  { %p956_p3 = pnand %p954_p2, %p951_p1 }
 0x4c1   :  { %959 = shalt.err (!%p956_p3)
}
 0x4c2   :  { %699 = dma.vmem_to_hbm [thread:$0]  %s697_s26, 256, %s1364_s4, [#allocation4]  }
 0x4c3   :  { %964 = dma.done.wait [#allocation4], 256  }
 0x4c4   :  { %965 = vsyncadd [#allocation4], 4294967040 }
 0x4c5   :  { %703 = vsyncpa [#allocation3], 1 }
 0x4c6   :  { %704 = vsyncpa [#allocation6], 1 }
 0x4c7   :  { %705 = vsyncpa [#allocation4], 1 }

</bundles_post_ra>
